<compile_context>
chip_gen: v5e
topology: v5e:2x2
jax: 0.10.0
libtpu: 0.0.40
codegen_flags: <defaults>
</compile_context>

<pallas_src>
import jax
import jax.numpy as jnp
from jax.experimental import pallas as pl
from jax.experimental.pallas import tpu as pltpu

# ---- small, deterministic "synthetic ViT" config (consistent with the module) ----
IMG, PATCH, CIN = 16, 8, 3               # 16x16 RGB image, 8x8 patches
EMBED, HEADS, DEPTH, MLP_HID = 32, 4, 4, 128
NPATCH = (IMG // PATCH) ** 2             # 4 patches
SEQ = NPATCH + 1                         # + CLS token = 5
S_PAD = 8                                # sequence padded to a full sublane group
HEAD_DIM = EMBED // HEADS                # 8
NBLK = DEPTH - 1                         # blocks executed: get_intermediate_layers(n={DEPTH-2})
PDIM = CIN * PATCH * PATCH               # 192
WA_COLS = 4 * EMBED + MLP_HID            # packed [w_qkv | w_proj | w_fc1] lane width = 256
LN_EPS = 1e-6                            # timm ViT LayerNorm eps
INV_SQRT2 = 0.7071067811865476
NEG_BIG = -1e30


def _erf(x):
    # float32-accurate rational approximation of erf (|err| ~ 1.5e-7), built only
    # from exp/mul/add + an EUP reciprocal so it lowers cleanly in Mosaic.
    a = jnp.abs(x)
    t = pl.reciprocal(1.0 + 0.5 * a, approx=True)
    poly = -1.26551223 + t * (1.00002368 + t * (0.37409196 + t * (0.09678418 + t * (
        -0.18628806 + t * (0.27886807 + t * (-1.13520398 + t * (1.48851587 + t * (
            -0.82215223 + t * 0.17087277))))))))
    tau = t * jnp.exp(-a * a + poly)
    return jnp.where(x >= 0.0, 1.0 - tau, tau - 1.0)


def _gelu_exact(x):
    # nn.GELU (exact, erf-based), timm's default act_layer
    return 0.5 * x * (1.0 + _erf(x * INV_SQRT2))


def _layernorm(x, gamma, beta):
    mu = jnp.mean(x, axis=-1, keepdims=True)
    var = jnp.mean((x - mu) * (x - mu), axis=-1, keepdims=True)
    return (x - mu) * jax.lax.rsqrt(var + LN_EPS) * gamma + beta


# ----------------------------- fused Pallas kernel --------------------------------

def fused_vit_kernel(patches_ref, pew_ref, init_ref, wa_ref, wfc2_ref, vec_ref, o_ref):
    # ---- patch embed + token assembly: one matmul + add (CLS/pos/bias folded
    #      into the precomputed init slab; rows SEQ..S_PAD-1 are pad tokens). ----
    x = jnp.dot(patches_ref[...], pew_ref[...],
                preferred_element_type=jnp.float32) + init_ref[...]        # (S_PAD, E) f32

    # key mask for the pad tokens (SEQ / S_PAD are static -> folds to a constant)
    kid = jax.lax.broadcasted_iota(jnp.int32, (1, S_PAD), 1)
    key_mask = jnp.where(kid < SEQ, 0.0, NEG_BIG).astype(jnp.float32)      # (1, S_PAD)

    for l in range(NBLK):                                                  # static unroll over depth
        wa = wa_ref[l]                           # (E, 256) bf16: [w_qkv | w_proj | w_fc1]
        w_qkv = wa[:, 0:3 * EMBED]
        w_proj = wa[:, 3 * EMBED:4 * EMBED]
        w_fc1 = wa[:, 4 * EMBED:4 * EMBED + MLP_HID]
        w_fc2 = wfc2_ref[l]                      # (MLP_HID, E) bf16
        vec = vec_ref[l]                         # (8, 128) f32 packed LN/bias slab
        ln1_g, ln1_b = vec[0:1, :EMBED], vec[1:2, :EMBED]
        ln2_g, ln2_b = vec[2:3, :EMBED], vec[3:4, :EMBED]
        b_proj, b_fc2 = vec[4:5, :EMBED], vec[5:6, :EMBED]
        b_fc1 = vec[6:7, :MLP_HID]
        b_qkv = vec[7:8, :3 * EMBED]             # attention scale already folded in

        # --- attention branch ---
        xn = _layernorm(x, ln1_g, ln1_b)
        qkv = jnp.dot(xn.astype(jnp.bfloat16), w_qkv,
                      preferred_element_type=jnp.float32) + b_qkv          # (S_PAD, 3E)
        ctx = []
        for h in range(HEADS):                                             # static, tiny (4)
            qh = qkv[:, h * HEAD_DIM:(h + 1) * HEAD_DIM].astype(jnp.bfloat16)
            kh = qkv[:, EMBED + h * HEAD_DIM:EMBED + (h + 1) * HEAD_DIM].astype(jnp.bfloat16)
            vh = qkv[:, 2 * EMBED + h * HEAD_DIM:2 * EMBED + (h + 1) * HEAD_DIM].astype(jnp.bfloat16)
            # contract on the last axis of both operands (no explicit transpose)
            s = jax.lax.dot_general(qh, kh, (((1,), (1,)), ((), ())),
                                    preferred_element_type=jnp.float32)    # (S_PAD, S_PAD)
            s = s + key_mask
            s = s - jnp.max(s, axis=-1, keepdims=True)
            p = jnp.exp(s)
            p = p * pl.reciprocal(jnp.sum(p, axis=-1, keepdims=True), approx=True)
            ctx.append(jnp.dot(p.astype(jnp.bfloat16), vh,
                               preferred_element_type=jnp.float32))        # (S_PAD, D)
        ctx = jnp.concatenate(ctx, axis=1)                                 # (S_PAD, E) lane concat
        attn = jnp.dot(ctx.astype(jnp.bfloat16), w_proj,
                       preferred_element_type=jnp.float32) + b_proj
        x = x + attn

        # --- MLP branch ---
        xn2 = _layernorm(x, ln2_g, ln2_b)
        h1 = jnp.dot(xn2.astype(jnp.bfloat16), w_fc1,
                     preferred_element_type=jnp.float32) + b_fc1           # (S_PAD, MLP)
        h1 = _gelu_exact(h1)
        h2 = jnp.dot(h1.astype(jnp.bfloat16), w_fc2,
                     preferred_element_type=jnp.float32) + b_fc2
        x = x + h2

    # lane-dense writeback: patch tokens (CLS + pad rows stripped) -> (1, NPATCH*E=128)
    o_ref[...] = jnp.concatenate([x[1 + p:2 + p, :] for p in range(NPATCH)], axis=1)


# ----------------------------- wrapper ---------------------------------------------

def vit_forward(pixel_values, params):
    """TimmViTBackbone.forward: returns patch features of the second-to-last
    transformer block (blocks 0..DEPTH-2 executed, no final norm), CLS stripped."""
    B = pixel_values.shape[0]

    # NCHW -> flattened non-overlapping patches (B, NPATCH, C*P*P), padded along the
    # sequence axis to S_PAD (row 0 = CLS slot, rows SEQ.. = pad) so every per-image
    # tile is (8, .)-sublane aligned.  Cheap XLA glue on a tiny tensor.
    # TODO(synk): folding this 6-D rearrange into the kernel would need an in-kernel
    # gather/relayout; left as one XLA op.
    x = pixel_values.reshape(B, CIN, IMG // PATCH, PATCH, IMG // PATCH, PATCH)
    x = x.transpose(0, 2, 4, 1, 3, 5).reshape(B, NPATCH, PDIM)
    patches = jnp.pad(x, ((0, 0), (1, S_PAD - SEQ), (0, 0))).astype(jnp.bfloat16)

    # patch-embed conv (stride==kernel) as a matmul; CLS / pos_embed / conv bias are
    # folded into a per-row "init" slab added after the patch-embed matmul.
    pe_w = params["conv_w"].reshape(EMBED, PDIM).T.astype(jnp.bfloat16)    # (PDIM, E)
    pe_b = params["conv_b"].reshape(1, EMBED)
    cls = params["cls_token"].reshape(1, EMBED)
    pos = params["pos_embed"].reshape(SEQ, EMBED)
    init = jnp.zeros((S_PAD, EMBED), jnp.float32)
    init = init.at[0:1].set(cls + pos[0:1])
    init = init.at[1:SEQ].set(pe_b + pos[1:SEQ])

    blocks = params["blocks"][:NBLK]

    def stk(name):
        return jnp.stack([blk[name] for blk in blocks], axis=0)

    # fold the attention scale into the Q projection (weights AND bias) at trace time
    scale = HEAD_DIM ** -0.5
    qscale = jnp.concatenate([jnp.full((EMBED,), scale, jnp.float32),
                              jnp.ones((2 * EMBED,), jnp.float32)])
    w_qkv = stk("w_qkv") * qscale                                          # (NB, E, 3E)
    b_qkv = stk("b_qkv") * qscale                                          # (NB, 1, 3E)

    # packed lane-dense weight slabs (few wide DMAs instead of 20+ micro-DMAs)
    wa = jnp.concatenate([w_qkv, stk("w_proj"), stk("w_fc1")],
                         axis=2).astype(jnp.bfloat16)                      # (NB, E, 256)
    wfc2 = stk("w_fc2").astype(jnp.bfloat16)                               # (NB, MLP, E)

    vec = jnp.zeros((NBLK, 8, 128), jnp.float32)                           # LN/bias slab
    vec = vec.at[:, 0, :EMBED].set(stk("ln1_g")[:, 0, :])
    vec = vec.at[:, 1, :EMBED].set(stk("ln1_b")[:, 0, :])
    vec = vec.at[:, 2, :EMBED].set(stk("ln2_g")[:, 0, :])
    vec = vec.at[:, 3, :EMBED].set(stk("ln2_b")[:, 0, :])
    vec = vec.at[:, 4, :EMBED].set(stk("b_proj")[:, 0, :])
    vec = vec.at[:, 5, :EMBED].set(stk("b_fc2")[:, 0, :])
    vec = vec.at[:, 6, :MLP_HID].set(stk("b_fc1")[:, 0, :])
    vec = vec.at[:, 7, :3 * EMBED].set(b_qkv[:, 0, :])

    # Grid over batch (one image per step, "parallel" => split across TensorCores on
    # v7x; a cheap serial loop on v5e/v6e).  Weight slabs use a constant index_map so
    # they stay VMEM-resident and are not re-DMA'd per step.  At real-ViT scale the
    # depth loop would move onto an "arbitrary" grid axis with per-layer weight
    # BlockSpecs and an explicit vmem_limit_bytes.
    out = pl.pallas_call(
        fused_vit_kernel,
        out_shape=jax.ShapeDtypeStruct((B, 1, NPATCH * EMBED), jnp.float32),
        grid=(B,),
        in_specs=[
            pl.BlockSpec((None, S_PAD, PDIM), lambda b: (b, 0, 0)),
            pl.BlockSpec((PDIM, EMBED), lambda b: (0, 0)),
            pl.BlockSpec((S_PAD, EMBED), lambda b: (0, 0)),
            pl.BlockSpec((NBLK, EMBED, WA_COLS), lambda b: (0, 0, 0)),
            pl.BlockSpec((NBLK, MLP_HID, EMBED), lambda b: (0, 0, 0)),
            pl.BlockSpec((NBLK, 8, 128), lambda b: (0, 0, 0)),
        ],
        out_specs=pl.BlockSpec((None, 1, NPATCH * EMBED), lambda b: (b, 0, 0)),
        compiler_params=pltpu.CompilerParams(dimension_semantics=("parallel",)),
    )(patches, pe_w, init, wa, wfc2, vec)

    return out.reshape(B, NPATCH, EMBED)


# ----------------------------- deterministic parameter init ------------------------

def init_params(key):
    n_rand = 3 + 4 * DEPTH
    ks = list(jax.random.split(key, n_rand))
    it = iter(ks)

    def nrm(shape, std=0.02):
        return std * jax.random.normal(next(it), shape, jnp.float32)

    params = {
        "conv_w": nrm((EMBED, CIN, PATCH, PATCH)),          # PyTorch conv weight layout
        "conv_b": jnp.zeros((EMBED,), jnp.float32),
        "cls_token": nrm((1, 1, EMBED)),
        "pos_embed": nrm((1, SEQ, EMBED)),
        "blocks": [],
    }
    for _ in range(DEPTH):
        params["blocks"].append({
            "ln1_g": jnp.ones((1, EMBED), jnp.float32),
            "ln1_b": jnp.zeros((1, EMBED), jnp.float32),
            "w_qkv": nrm((EMBED, 3 * EMBED)),
            "b_qkv": jnp.zeros((1, 3 * EMBED), jnp.float32),
            "w_proj": nrm((EMBED, EMBED)),
            "b_proj": jnp.zeros((1, EMBED), jnp.float32),
            "ln2_g": jnp.ones((1, EMBED), jnp.float32),
            "ln2_b": jnp.zeros((1, EMBED), jnp.float32),
            "w_fc1": nrm((EMBED, MLP_HID)),
            "b_fc1": jnp.zeros((1, MLP_HID), jnp.float32),
            "w_fc2": nrm((MLP_HID, EMBED)),
            "b_fc2": jnp.zeros((1, EMBED), jnp.float32),
        })
    return params


# TODO(synk): image_transform (PIL Resize / CenterCrop / LetterboxPad / normalize),
# pretrained timm checkpoint loading, and the FSDP wrapping policy are host-side /
# framework plumbing with no Pallas equivalent and are intentionally not implemented.

if __name__ == "__main__":
    key = jax.random.PRNGKey(0)
    k_params, k_pix = jax.random.split(key)
    params = init_params(k_params)
    pixel_values = jax.random.normal(k_pix, (2, CIN, IMG, IMG), jnp.float32)  # NCHW

    out = jax.jit(vit_forward)(pixel_values, params)
    out = jax.block_until_ready(out)

    assert out.shape == (2, NPATCH, EMBED), out.shape
    assert out.dtype == jnp.float32
    assert bool(jnp.all(jnp.isfinite(out)))
    print("KERNEL_OK")
</pallas_src>

<mosaic_0001>
module attributes {stable_mosaic.version = 11 : i64} {
  func.func @fused_vit_kernel(%arg0: i32, %arg1: memref<1x8x192xbf16, #tpu.memory_space<vmem>>, %arg2: memref<192x32xbf16, #tpu.memory_space<vmem>>, %arg3: memref<8x32xf32, #tpu.memory_space<vmem>>, %arg4: memref<3x32x256xbf16, #tpu.memory_space<vmem>>, %arg5: memref<3x128x32xbf16, #tpu.memory_space<vmem>>, %arg6: memref<3x8x128xf32, #tpu.memory_space<vmem>>, %arg7: memref<1x1x128xf32, #tpu.memory_space<vmem>>) attributes {dimension_semantics = [#tpu.dimension_semantics<parallel>], iteration_bounds = array<i64: 2>, scalar_prefetch = 0 : i64, scratch_operands = 0 : i64, tpu.core_type = #tpu.core_type<tc>, window_params = [{transform_indices = @transform_0, window_bounds = array<i64: 1, 8, 192>}, {pipeline_mode = #tpu.pipeline_mode<synchronous>, transform_indices = @transform_1, window_bounds = array<i64: 192, 32>}, {pipeline_mode = #tpu.pipeline_mode<synchronous>, transform_indices = @transform_2, window_bounds = array<i64: 8, 32>}, {pipeline_mode = #tpu.pipeline_mode<synchronous>, transform_indices = @transform_3, window_bounds = array<i64: 3, 32, 256>}, {pipeline_mode = #tpu.pipeline_mode<synchronous>, transform_indices = @transform_4, window_bounds = array<i64: 3, 128, 32>}, {pipeline_mode = #tpu.pipeline_mode<synchronous>, transform_indices = @transform_5, window_bounds = array<i64: 3, 8, 128>}, {transform_indices = @transform_6, window_bounds = array<i64: 1, 1, 128>}]} {
    %c0 = arith.constant 0 : index
    %c0_0 = arith.constant 0 : index
    %c0_1 = arith.constant 0 : index
    %0 = vector.load %arg1[%c0, %c0_0, %c0_1] : memref<1x8x192xbf16, #tpu.memory_space<vmem>>, vector<1x8x192xbf16>
    %1 = vector.shape_cast %0 : vector<1x8x192xbf16> to vector<8x192xbf16>
    %c0_2 = arith.constant 0 : index
    %c0_3 = arith.constant 0 : index
    %2 = vector.load %arg2[%c0_2, %c0_3] : memref<192x32xbf16, #tpu.memory_space<vmem>>, vector<192x32xbf16>
    %cst = arith.constant dense<0.000000e+00> : vector<8x32xf32>
    %3 = tpu.matmul %1, %2, %cst {dimension_numbers = #tpu.dot_dimension_numbers<[1], [0], [0], [1], [0, 0, 1, 1], [], []>} : vector<8x192xbf16>, vector<192x32xbf16>, vector<8x32xf32> -> vector<8x32xf32>
    %c0_4 = arith.constant 0 : index
    %c0_5 = arith.constant 0 : index
    %4 = vector.load %arg3[%c0_4, %c0_5] : memref<8x32xf32, #tpu.memory_space<vmem>>, vector<8x32xf32>
    %5 = arith.addf %3, %4 : vector<8x32xf32>
    %6 = tpu.iota {dimensions = array<i32: 1>} : vector<1x8xi32>
    %c5_i32 = arith.constant 5 : i32
    %7 = vector.broadcast %c5_i32 : i32 to vector<1x8xi32>
    %8 = arith.cmpi slt, %6, %7 : vector<1x8xi32>
    %cst_6 = arith.constant 0.000000e+00 : f32
    %cst_7 = arith.constant -1.000000e+30 : f32
    %9 = vector.broadcast %cst_6 : f32 to vector<1x8xf32>
    %10 = vector.broadcast %cst_7 : f32 to vector<1x8xf32>
    %11 = arith.select %8, %9, %10 : vector<1x8xi1>, vector<1x8xf32>
    %c0_8 = arith.constant 0 : index
    %c0_9 = arith.constant 0 : index
    %c0_10 = arith.constant 0 : index
    %12 = vector.load %arg4[%c0_8, %c0_9, %c0_10] : memref<3x32x256xbf16, #tpu.memory_space<vmem>>, vector<1x32x256xbf16>
    %13 = vector.shape_cast %12 : vector<1x32x256xbf16> to vector<32x256xbf16>
    %14 = vector.extract_strided_slice %13 {offsets = [0, 0], sizes = [32, 96], strides = [1, 1]} : vector<32x256xbf16> to vector<32x96xbf16>
    %15 = vector.extract_strided_slice %13 {offsets = [0, 96], sizes = [32, 32], strides = [1, 1]} : vector<32x256xbf16> to vector<32x32xbf16>
    %16 = vector.extract_strided_slice %13 {offsets = [0, 128], sizes = [32, 128], strides = [1, 1]} : vector<32x256xbf16> to vector<32x128xbf16>
    %c0_11 = arith.constant 0 : index
    %c0_12 = arith.constant 0 : index
    %c0_13 = arith.constant 0 : index
    %17 = vector.load %arg5[%c0_11, %c0_12, %c0_13] : memref<3x128x32xbf16, #tpu.memory_space<vmem>>, vector<1x128x32xbf16>
    %18 = vector.shape_cast %17 : vector<1x128x32xbf16> to vector<128x32xbf16>
    %c0_14 = arith.constant 0 : index
    %c0_15 = arith.constant 0 : index
    %c0_16 = arith.constant 0 : index
    %19 = vector.load %arg6[%c0_14, %c0_15, %c0_16] : memref<3x8x128xf32, #tpu.memory_space<vmem>>, vector<1x8x128xf32>
    %20 = vector.shape_cast %19 : vector<1x8x128xf32> to vector<8x128xf32>
    %21 = vector.extract_strided_slice %20 {offsets = [0, 0], sizes = [1, 32], strides = [1, 1]} : vector<8x128xf32> to vector<1x32xf32>
    %22 = vector.extract_strided_slice %20 {offsets = [1, 0], sizes = [1, 32], strides = [1, 1]} : vector<8x128xf32> to vector<1x32xf32>
    %23 = vector.extract_strided_slice %20 {offsets = [2, 0], sizes = [1, 32], strides = [1, 1]} : vector<8x128xf32> to vector<1x32xf32>
    %24 = vector.extract_strided_slice %20 {offsets = [3, 0], sizes = [1, 32], strides = [1, 1]} : vector<8x128xf32> to vector<1x32xf32>
    %25 = vector.extract_strided_slice %20 {offsets = [4, 0], sizes = [1, 32], strides = [1, 1]} : vector<8x128xf32> to vector<1x32xf32>
    %26 = vector.extract_strided_slice %20 {offsets = [5, 0], sizes = [1, 32], strides = [1, 1]} : vector<8x128xf32> to vector<1x32xf32>
    %27 = vector.extract_strided_slice %20 {offsets = [6, 0], sizes = [1, 128], strides = [1, 1]} : vector<8x128xf32> to vector<1x128xf32>
    %28 = vector.extract_strided_slice %20 {offsets = [7, 0], sizes = [1, 96], strides = [1, 1]} : vector<8x128xf32> to vector<1x96xf32>
    %cst_17 = arith.constant dense<0.000000e+00> : vector<8xf32>
    %29 = vector.multi_reduction <add>, %5, %cst_17 [1] : vector<8x32xf32> to vector<8xf32>
    %30 = vector.shape_cast %29 : vector<8xf32> to vector<8x1xf32>
    %cst_18 = arith.constant 3.200000e+01 : f32
    %31 = vector.broadcast %cst_18 : f32 to vector<8x1xf32>
    %32 = arith.divf %30, %31 : vector<8x1xf32>
    %33 = vector.broadcast %32 : vector<8x1xf32> to vector<8x32xf32>
    %34 = arith.subf %5, %33 : vector<8x32xf32>
    %35 = vector.broadcast %32 : vector<8x1xf32> to vector<8x32xf32>
    %36 = arith.subf %5, %35 : vector<8x32xf32>
    %37 = arith.mulf %34, %36 : vector<8x32xf32>
    %cst_19 = arith.constant dense<0.000000e+00> : vector<8xf32>
    %38 = vector.multi_reduction <add>, %37, %cst_19 [1] : vector<8x32xf32> to vector<8xf32>
    %39 = vector.shape_cast %38 : vector<8xf32> to vector<8x1xf32>
    %cst_20 = arith.constant 3.200000e+01 : f32
    %40 = vector.broadcast %cst_20 : f32 to vector<8x1xf32>
    %41 = arith.divf %39, %40 : vector<8x1xf32>
    %42 = vector.broadcast %32 : vector<8x1xf32> to vector<8x32xf32>
    %43 = arith.subf %5, %42 : vector<8x32xf32>
    %cst_21 = arith.constant 9.99999997E-7 : f32
    %44 = vector.broadcast %cst_21 : f32 to vector<8x1xf32>
    %45 = arith.addf %41, %44 : vector<8x1xf32>
    %46 = math.rsqrt %45 : vector<8x1xf32>
    %47 = vector.broadcast %46 : vector<8x1xf32> to vector<8x32xf32>
    %48 = arith.mulf %43, %47 : vector<8x32xf32>
    %49 = vector.broadcast %21 : vector<1x32xf32> to vector<8x32xf32>
    %50 = arith.mulf %48, %49 : vector<8x32xf32>
    %51 = vector.broadcast %22 : vector<1x32xf32> to vector<8x32xf32>
    %52 = arith.addf %50, %51 : vector<8x32xf32>
    %53 = arith.truncf %52 : vector<8x32xf32> to vector<8x32xbf16>
    %cst_22 = arith.constant dense<0.000000e+00> : vector<8x96xf32>
    %54 = tpu.matmul %53, %14, %cst_22 {dimension_numbers = #tpu.dot_dimension_numbers<[1], [0], [0], [1], [0, 0, 1, 1], [], []>} : vector<8x32xbf16>, vector<32x96xbf16>, vector<8x96xf32> -> vector<8x96xf32>
    %55 = vector.broadcast %28 : vector<1x96xf32> to vector<8x96xf32>
    %56 = arith.addf %54, %55 : vector<8x96xf32>
    %57 = vector.extract_strided_slice %56 {offsets = [0, 0], sizes = [8, 8], strides = [1, 1]} : vector<8x96xf32> to vector<8x8xf32>
    %58 = arith.truncf %57 : vector<8x8xf32> to vector<8x8xbf16>
    %59 = vector.extract_strided_slice %56 {offsets = [0, 32], sizes = [8, 8], strides = [1, 1]} : vector<8x96xf32> to vector<8x8xf32>
    %60 = arith.truncf %59 : vector<8x8xf32> to vector<8x8xbf16>
    %61 = vector.extract_strided_slice %56 {offsets = [0, 64], sizes = [8, 8], strides = [1, 1]} : vector<8x96xf32> to vector<8x8xf32>
    %62 = arith.truncf %61 : vector<8x8xf32> to vector<8x8xbf16>
    %cst_23 = arith.constant dense<0.000000e+00> : vector<8x8xf32>
    %63 = tpu.matmul %58, %60, %cst_23 {dimension_numbers = #tpu.dot_dimension_numbers<[1], [1], [0], [0], [0, 0, 1, 0], [], []>} : vector<8x8xbf16>, vector<8x8xbf16>, vector<8x8xf32> -> vector<8x8xf32>
    %64 = vector.broadcast %11 : vector<1x8xf32> to vector<8x8xf32>
    %65 = arith.addf %63, %64 : vector<8x8xf32>
    %cst_24 = arith.constant dense<0xFF800000> : vector<8xf32>
    %66 = vector.multi_reduction <maximumf>, %65, %cst_24 [1] : vector<8x8xf32> to vector<8xf32>
    %67 = vector.shape_cast %66 : vector<8xf32> to vector<8x1xf32>
    %68 = vector.broadcast %67 : vector<8x1xf32> to vector<8x8xf32>
    %69 = arith.subf %65, %68 : vector<8x8xf32>
    %70 = math.exp %69 : vector<8x8xf32>
    %cst_25 = arith.constant dense<0.000000e+00> : vector<8xf32>
    %71 = vector.multi_reduction <add>, %70, %cst_25 [1] : vector<8x8xf32> to vector<8xf32>
    %72 = vector.shape_cast %71 : vector<8xf32> to vector<8x1xf32>
    %73 = tpu.reciprocal %72 {approx = true} : vector<8x1xf32> -> vector<8x1xf32>
    %74 = vector.broadcast %73 : vector<8x1xf32> to vector<8x8xf32>
    %75 = arith.mulf %70, %74 : vector<8x8xf32>
    %76 = arith.truncf %75 : vector<8x8xf32> to vector<8x8xbf16>
    %cst_26 = arith.constant dense<0.000000e+00> : vector<8x8xf32>
    %77 = tpu.matmul %76, %62, %cst_26 {dimension_numbers = #tpu.dot_dimension_numbers<[1], [0], [0], [1], [0, 0, 1, 1], [], []>} : vector<8x8xbf16>, vector<8x8xbf16>, vector<8x8xf32> -> vector<8x8xf32>
    %78 = vector.extract_strided_slice %56 {offsets = [0, 8], sizes = [8, 8], strides = [1, 1]} : vector<8x96xf32> to vector<8x8xf32>
    %79 = arith.truncf %78 : vector<8x8xf32> to vector<8x8xbf16>
    %80 = vector.extract_strided_slice %56 {offsets = [0, 40], sizes = [8, 8], strides = [1, 1]} : vector<8x96xf32> to vector<8x8xf32>
    %81 = arith.truncf %80 : vector<8x8xf32> to vector<8x8xbf16>
    %82 = vector.extract_strided_slice %56 {offsets = [0, 72], sizes = [8, 8], strides = [1, 1]} : vector<8x96xf32> to vector<8x8xf32>
    %83 = arith.truncf %82 : vector<8x8xf32> to vector<8x8xbf16>
    %cst_27 = arith.constant dense<0.000000e+00> : vector<8x8xf32>
    %84 = tpu.matmul %79, %81, %cst_27 {dimension_numbers = #tpu.dot_dimension_numbers<[1], [1], [0], [0], [0, 0, 1, 0], [], []>} : vector<8x8xbf16>, vector<8x8xbf16>, vector<8x8xf32> -> vector<8x8xf32>
    %85 = vector.broadcast %11 : vector<1x8xf32> to vector<8x8xf32>
    %86 = arith.addf %84, %85 : vector<8x8xf32>
    %cst_28 = arith.constant dense<0xFF800000> : vector<8xf32>
    %87 = vector.multi_reduction <maximumf>, %86, %cst_28 [1] : vector<8x8xf32> to vector<8xf32>
    %88 = vector.shape_cast %87 : vector<8xf32> to vector<8x1xf32>
    %89 = vector.broadcast %88 : vector<8x1xf32> to vector<8x8xf32>
    %90 = arith.subf %86, %89 : vector<8x8xf32>
    %91 = math.exp %90 : vector<8x8xf32>
    %cst_29 = arith.constant dense<0.000000e+00> : vector<8xf32>
    %92 = vector.multi_reduction <add>, %91, %cst_29 [1] : vector<8x8xf32> to vector<8xf32>
    %93 = vector.shape_cast %92 : vector<8xf32> to vector<8x1xf32>
    %94 = tpu.reciprocal %93 {approx = true} : vector<8x1xf32> -> vector<8x1xf32>
    %95 = vector.broadcast %94 : vector<8x1xf32> to vector<8x8xf32>
    %96 = arith.mulf %91, %95 : vector<8x8xf32>
    %97 = arith.truncf %96 : vector<8x8xf32> to vector<8x8xbf16>
    %cst_30 = arith.constant dense<0.000000e+00> : vector<8x8xf32>
    %98 = tpu.matmul %97, %83, %cst_30 {dimension_numbers = #tpu.dot_dimension_numbers<[1], [0], [0], [1], [0, 0, 1, 1], [], []>} : vector<8x8xbf16>, vector<8x8xbf16>, vector<8x8xf32> -> vector<8x8xf32>
    %99 = vector.extract_strided_slice %56 {offsets = [0, 16], sizes = [8, 8], strides = [1, 1]} : vector<8x96xf32> to vector<8x8xf32>
    %100 = arith.truncf %99 : vector<8x8xf32> to vector<8x8xbf16>
    %101 = vector.extract_strided_slice %56 {offsets = [0, 48], sizes = [8, 8], strides = [1, 1]} : vector<8x96xf32> to vector<8x8xf32>
    %102 = arith.truncf %101 : vector<8x8xf32> to vector<8x8xbf16>
    %103 = vector.extract_strided_slice %56 {offsets = [0, 80], sizes = [8, 8], strides = [1, 1]} : vector<8x96xf32> to vector<8x8xf32>
    %104 = arith.truncf %103 : vector<8x8xf32> to vector<8x8xbf16>
    %cst_31 = arith.constant dense<0.000000e+00> : vector<8x8xf32>
    %105 = tpu.matmul %100, %102, %cst_31 {dimension_numbers = #tpu.dot_dimension_numbers<[1], [1], [0], [0], [0, 0, 1, 0], [], []>} : vector<8x8xbf16>, vector<8x8xbf16>, vector<8x8xf32> -> vector<8x8xf32>
    %106 = vector.broadcast %11 : vector<1x8xf32> to vector<8x8xf32>
    %107 = arith.addf %105, %106 : vector<8x8xf32>
    %cst_32 = arith.constant dense<0xFF800000> : vector<8xf32>
    %108 = vector.multi_reduction <maximumf>, %107, %cst_32 [1] : vector<8x8xf32> to vector<8xf32>
    %109 = vector.shape_cast %108 : vector<8xf32> to vector<8x1xf32>
    %110 = vector.broadcast %109 : vector<8x1xf32> to vector<8x8xf32>
    %111 = arith.subf %107, %110 : vector<8x8xf32>
    %112 = math.exp %111 : vector<8x8xf32>
    %cst_33 = arith.constant dense<0.000000e+00> : vector<8xf32>
    %113 = vector.multi_reduction <add>, %112, %cst_33 [1] : vector<8x8xf32> to vector<8xf32>
    %114 = vector.shape_cast %113 : vector<8xf32> to vector<8x1xf32>
    %115 = tpu.reciprocal %114 {approx = true} : vector<8x1xf32> -> vector<8x1xf32>
    %116 = vector.broadcast %115 : vector<8x1xf32> to vector<8x8xf32>
    %117 = arith.mulf %112, %116 : vector<8x8xf32>
    %118 = arith.truncf %117 : vector<8x8xf32> to vector<8x8xbf16>
    %cst_34 = arith.constant dense<0.000000e+00> : vector<8x8xf32>
    %119 = tpu.matmul %118, %104, %cst_34 {dimension_numbers = #tpu.dot_dimension_numbers<[1], [0], [0], [1], [0, 0, 1, 1], [], []>} : vector<8x8xbf16>, vector<8x8xbf16>, vector<8x8xf32> -> vector<8x8xf32>
    %120 = vector.extract_strided_slice %56 {offsets = [0, 24], sizes = [8, 8], strides = [1, 1]} : vector<8x96xf32> to vector<8x8xf32>
    %121 = arith.truncf %120 : vector<8x8xf32> to vector<8x8xbf16>
    %122 = vector.extract_strided_slice %56 {offsets = [0, 56], sizes = [8, 8], strides = [1, 1]} : vector<8x96xf32> to vector<8x8xf32>
    %123 = arith.truncf %122 : vector<8x8xf32> to vector<8x8xbf16>
    %124 = vector.extract_strided_slice %56 {offsets = [0, 88], sizes = [8, 8], strides = [1, 1]} : vector<8x96xf32> to vector<8x8xf32>
    %125 = arith.truncf %124 : vector<8x8xf32> to vector<8x8xbf16>
    %cst_35 = arith.constant dense<0.000000e+00> : vector<8x8xf32>
    %126 = tpu.matmul %121, %123, %cst_35 {dimension_numbers = #tpu.dot_dimension_numbers<[1], [1], [0], [0], [0, 0, 1, 0], [], []>} : vector<8x8xbf16>, vector<8x8xbf16>, vector<8x8xf32> -> vector<8x8xf32>
    %127 = vector.broadcast %11 : vector<1x8xf32> to vector<8x8xf32>
    %128 = arith.addf %126, %127 : vector<8x8xf32>
    %cst_36 = arith.constant dense<0xFF800000> : vector<8xf32>
    %129 = vector.multi_reduction <maximumf>, %128, %cst_36 [1] : vector<8x8xf32> to vector<8xf32>
    %130 = vector.shape_cast %129 : vector<8xf32> to vector<8x1xf32>
    %131 = vector.broadcast %130 : vector<8x1xf32> to vector<8x8xf32>
    %132 = arith.subf %128, %131 : vector<8x8xf32>
    %133 = math.exp %132 : vector<8x8xf32>
    %cst_37 = arith.constant dense<0.000000e+00> : vector<8xf32>
    %134 = vector.multi_reduction <add>, %133, %cst_37 [1] : vector<8x8xf32> to vector<8xf32>
    %135 = vector.shape_cast %134 : vector<8xf32> to vector<8x1xf32>
    %136 = tpu.reciprocal %135 {approx = true} : vector<8x1xf32> -> vector<8x1xf32>
    %137 = vector.broadcast %136 : vector<8x1xf32> to vector<8x8xf32>
    %138 = arith.mulf %133, %137 : vector<8x8xf32>
    %139 = arith.truncf %138 : vector<8x8xf32> to vector<8x8xbf16>
    %cst_38 = arith.constant dense<0.000000e+00> : vector<8x8xf32>
    %140 = tpu.matmul %139, %125, %cst_38 {dimension_numbers = #tpu.dot_dimension_numbers<[1], [0], [0], [1], [0, 0, 1, 1], [], []>} : vector<8x8xbf16>, vector<8x8xbf16>, vector<8x8xf32> -> vector<8x8xf32>
    %141 = tpu.concatenate %77, %98, %119, %140 in 1 : vector<8x8xf32>, vector<8x8xf32>, vector<8x8xf32>, vector<8x8xf32> -> vector<8x32xf32>
    %142 = arith.truncf %141 : vector<8x32xf32> to vector<8x32xbf16>
    %cst_39 = arith.constant dense<0.000000e+00> : vector<8x32xf32>
    %143 = tpu.matmul %142, %15, %cst_39 {dimension_numbers = #tpu.dot_dimension_numbers<[1], [0], [0], [1], [0, 0, 1, 1], [], []>} : vector<8x32xbf16>, vector<32x32xbf16>, vector<8x32xf32> -> vector<8x32xf32>
    %144 = vector.broadcast %25 : vector<1x32xf32> to vector<8x32xf32>
    %145 = arith.addf %143, %144 : vector<8x32xf32>
    %146 = arith.addf %5, %145 : vector<8x32xf32>
    %cst_40 = arith.constant dense<0.000000e+00> : vector<8xf32>
    %147 = vector.multi_reduction <add>, %146, %cst_40 [1] : vector<8x32xf32> to vector<8xf32>
    %148 = vector.shape_cast %147 : vector<8xf32> to vector<8x1xf32>
    %cst_41 = arith.constant 3.200000e+01 : f32
    %149 = vector.broadcast %cst_41 : f32 to vector<8x1xf32>
    %150 = arith.divf %148, %149 : vector<8x1xf32>
    %151 = vector.broadcast %150 : vector<8x1xf32> to vector<8x32xf32>
    %152 = arith.subf %146, %151 : vector<8x32xf32>
    %153 = vector.broadcast %150 : vector<8x1xf32> to vector<8x32xf32>
    %154 = arith.subf %146, %153 : vector<8x32xf32>
    %155 = arith.mulf %152, %154 : vector<8x32xf32>
    %cst_42 = arith.constant dense<0.000000e+00> : vector<8xf32>
    %156 = vector.multi_reduction <add>, %155, %cst_42 [1] : vector<8x32xf32> to vector<8xf32>
    %157 = vector.shape_cast %156 : vector<8xf32> to vector<8x1xf32>
    %cst_43 = arith.constant 3.200000e+01 : f32
    %158 = vector.broadcast %cst_43 : f32 to vector<8x1xf32>
    %159 = arith.divf %157, %158 : vector<8x1xf32>
    %160 = vector.broadcast %150 : vector<8x1xf32> to vector<8x32xf32>
    %161 = arith.subf %146, %160 : vector<8x32xf32>
    %cst_44 = arith.constant 9.99999997E-7 : f32
    %162 = vector.broadcast %cst_44 : f32 to vector<8x1xf32>
    %163 = arith.addf %159, %162 : vector<8x1xf32>
    %164 = math.rsqrt %163 : vector<8x1xf32>
    %165 = vector.broadcast %164 : vector<8x1xf32> to vector<8x32xf32>
    %166 = arith.mulf %161, %165 : vector<8x32xf32>
    %167 = vector.broadcast %23 : vector<1x32xf32> to vector<8x32xf32>
    %168 = arith.mulf %166, %167 : vector<8x32xf32>
    %169 = vector.broadcast %24 : vector<1x32xf32> to vector<8x32xf32>
    %170 = arith.addf %168, %169 : vector<8x32xf32>
    %171 = arith.truncf %170 : vector<8x32xf32> to vector<8x32xbf16>
    %cst_45 = arith.constant dense<0.000000e+00> : vector<8x128xf32>
    %172 = tpu.matmul %171, %16, %cst_45 {dimension_numbers = #tpu.dot_dimension_numbers<[1], [0], [0], [1], [0, 0, 1, 1], [], []>} : vector<8x32xbf16>, vector<32x128xbf16>, vector<8x128xf32> -> vector<8x128xf32>
    %173 = vector.broadcast %27 : vector<1x128xf32> to vector<8x128xf32>
    %174 = arith.addf %172, %173 : vector<8x128xf32>
    %cst_46 = arith.constant 5.000000e-01 : f32
    %175 = vector.broadcast %cst_46 : f32 to vector<8x128xf32>
    %176 = arith.mulf %175, %174 : vector<8x128xf32>
    %cst_47 = arith.constant 0.707106769 : f32
    %177 = vector.broadcast %cst_47 : f32 to vector<8x128xf32>
    %178 = arith.mulf %174, %177 : vector<8x128xf32>
    %179 = math.absf %178 : vector<8x128xf32>
    %cst_48 = arith.constant 5.000000e-01 : f32
    %180 = vector.broadcast %cst_48 : f32 to vector<8x128xf32>
    %181 = arith.mulf %180, %179 : vector<8x128xf32>
    %cst_49 = arith.constant 1.000000e+00 : f32
    %182 = vector.broadcast %cst_49 : f32 to vector<8x128xf32>
    %183 = arith.addf %182, %181 : vector<8x128xf32>
    %184 = tpu.reciprocal %183 {approx = true} : vector<8x128xf32> -> vector<8x128xf32>
    %cst_50 = arith.constant 0.170872763 : f32
    %185 = vector.broadcast %cst_50 : f32 to vector<8x128xf32>
    %186 = arith.mulf %184, %185 : vector<8x128xf32>
    %cst_51 = arith.constant -0.822152256 : f32
    %187 = vector.broadcast %cst_51 : f32 to vector<8x128xf32>
    %188 = arith.addf %187, %186 : vector<8x128xf32>
    %189 = arith.mulf %184, %188 : vector<8x128xf32>
    %cst_52 = arith.constant 1.48851585 : f32
    %190 = vector.broadcast %cst_52 : f32 to vector<8x128xf32>
    %191 = arith.addf %190, %189 : vector<8x128xf32>
    %192 = arith.mulf %184, %191 : vector<8x128xf32>
    %cst_53 = arith.constant -1.13520396 : f32
    %193 = vector.broadcast %cst_53 : f32 to vector<8x128xf32>
    %194 = arith.addf %193, %192 : vector<8x128xf32>
    %195 = arith.mulf %184, %194 : vector<8x128xf32>
    %cst_54 = arith.constant 0.278868079 : f32
    %196 = vector.broadcast %cst_54 : f32 to vector<8x128xf32>
    %197 = arith.addf %196, %195 : vector<8x128xf32>
    %198 = arith.mulf %184, %197 : vector<8x128xf32>
    %cst_55 = arith.constant -0.186288059 : f32
    %199 = vector.broadcast %cst_55 : f32 to vector<8x128xf32>
    %200 = arith.addf %199, %198 : vector<8x128xf32>
    %201 = arith.mulf %184, %200 : vector<8x128xf32>
    %cst_56 = arith.constant 0.0967841818 : f32
    %202 = vector.broadcast %cst_56 : f32 to vector<8x128xf32>
    %203 = arith.addf %202, %201 : vector<8x128xf32>
    %204 = arith.mulf %184, %203 : vector<8x128xf32>
    %cst_57 = arith.constant 0.374091953 : f32
    %205 = vector.broadcast %cst_57 : f32 to vector<8x128xf32>
    %206 = arith.addf %205, %204 : vector<8x128xf32>
    %207 = arith.mulf %184, %206 : vector<8x128xf32>
    %cst_58 = arith.constant 1.00002372 : f32
    %208 = vector.broadcast %cst_58 : f32 to vector<8x128xf32>
    %209 = arith.addf %208, %207 : vector<8x128xf32>
    %210 = arith.mulf %184, %209 : vector<8x128xf32>
    %cst_59 = arith.constant -1.26551223 : f32
    %211 = vector.broadcast %cst_59 : f32 to vector<8x128xf32>
    %212 = arith.addf %211, %210 : vector<8x128xf32>
    %cst_60 = arith.constant 0.000000e+00 : f32
    %213 = vector.broadcast %cst_60 : f32 to vector<8x128xf32>
    %214 = arith.subf %213, %179 : vector<8x128xf32>
    %215 = arith.mulf %214, %179 : vector<8x128xf32>
    %216 = arith.addf %215, %212 : vector<8x128xf32>
    %217 = math.exp %216 : vector<8x128xf32>
    %218 = arith.mulf %184, %217 : vector<8x128xf32>
    %cst_61 = arith.constant 0.000000e+00 : f32
    %219 = vector.broadcast %cst_61 : f32 to vector<8x128xf32>
    %220 = arith.cmpf oge, %178, %219 : vector<8x128xf32>
    %cst_62 = arith.constant 1.000000e+00 : f32
    %221 = vector.broadcast %cst_62 : f32 to vector<8x128xf32>
    %222 = arith.subf %221, %218 : vector<8x128xf32>
    %cst_63 = arith.constant 1.000000e+00 : f32
    %223 = vector.broadcast %cst_63 : f32 to vector<8x128xf32>
    %224 = arith.subf %218, %223 : vector<8x128xf32>
    %225 = arith.select %220, %222, %224 : vector<8x128xi1>, vector<8x128xf32>
    %cst_64 = arith.constant 1.000000e+00 : f32
    %226 = vector.broadcast %cst_64 : f32 to vector<8x128xf32>
    %227 = arith.addf %226, %225 : vector<8x128xf32>
    %228 = arith.mulf %176, %227 : vector<8x128xf32>
    %229 = arith.truncf %228 : vector<8x128xf32> to vector<8x128xbf16>
    %cst_65 = arith.constant dense<0.000000e+00> : vector<8x32xf32>
    %230 = tpu.matmul %229, %18, %cst_65 {dimension_numbers = #tpu.dot_dimension_numbers<[1], [0], [0], [1], [0, 0, 1, 1], [], []>} : vector<8x128xbf16>, vector<128x32xbf16>, vector<8x32xf32> -> vector<8x32xf32>
    %231 = vector.broadcast %26 : vector<1x32xf32> to vector<8x32xf32>
    %232 = arith.addf %230, %231 : vector<8x32xf32>
    %233 = arith.addf %146, %232 : vector<8x32xf32>
    %c1 = arith.constant 1 : index
    %c0_66 = arith.constant 0 : index
    %c0_67 = arith.constant 0 : index
    %234 = vector.load %arg4[%c1, %c0_66, %c0_67] : memref<3x32x256xbf16, #tpu.memory_space<vmem>>, vector<1x32x256xbf16>
    %235 = vector.shape_cast %234 : vector<1x32x256xbf16> to vector<32x256xbf16>
    %236 = vector.extract_strided_slice %235 {offsets = [0, 0], sizes = [32, 96], strides = [1, 1]} : vector<32x256xbf16> to vector<32x96xbf16>
    %237 = vector.extract_strided_slice %235 {offsets = [0, 96], sizes = [32, 32], strides = [1, 1]} : vector<32x256xbf16> to vector<32x32xbf16>
    %238 = vector.extract_strided_slice %235 {offsets = [0, 128], sizes = [32, 128], strides = [1, 1]} : vector<32x256xbf16> to vector<32x128xbf16>
    %c1_68 = arith.constant 1 : index
    %c0_69 = arith.constant 0 : index
    %c0_70 = arith.constant 0 : index
    %239 = vector.load %arg5[%c1_68, %c0_69, %c0_70] : memref<3x128x32xbf16, #tpu.memory_space<vmem>>, vector<1x128x32xbf16>
    %240 = vector.shape_cast %239 : vector<1x128x32xbf16> to vector<128x32xbf16>
    %c1_71 = arith.constant 1 : index
    %c0_72 = arith.constant 0 : index
    %c0_73 = arith.constant 0 : index
    %241 = vector.load %arg6[%c1_71, %c0_72, %c0_73] : memref<3x8x128xf32, #tpu.memory_space<vmem>>, vector<1x8x128xf32>
    %242 = vector.shape_cast %241 : vector<1x8x128xf32> to vector<8x128xf32>
    %243 = vector.extract_strided_slice %242 {offsets = [0, 0], sizes = [1, 32], strides = [1, 1]} : vector<8x128xf32> to vector<1x32xf32>
    %244 = vector.extract_strided_slice %242 {offsets = [1, 0], sizes = [1, 32], strides = [1, 1]} : vector<8x128xf32> to vector<1x32xf32>
    %245 = vector.extract_strided_slice %242 {offsets = [2, 0], sizes = [1, 32], strides = [1, 1]} : vector<8x128xf32> to vector<1x32xf32>
    %246 = vector.extract_strided_slice %242 {offsets = [3, 0], sizes = [1, 32], strides = [1, 1]} : vector<8x128xf32> to vector<1x32xf32>
    %247 = vector.extract_strided_slice %242 {offsets = [4, 0], sizes = [1, 32], strides = [1, 1]} : vector<8x128xf32> to vector<1x32xf32>
    %248 = vector.extract_strided_slice %242 {offsets = [5, 0], sizes = [1, 32], strides = [1, 1]} : vector<8x128xf32> to vector<1x32xf32>
    %249 = vector.extract_strided_slice %242 {offsets = [6, 0], sizes = [1, 128], strides = [1, 1]} : vector<8x128xf32> to vector<1x128xf32>
    %250 = vector.extract_strided_slice %242 {offsets = [7, 0], sizes = [1, 96], strides = [1, 1]} : vector<8x128xf32> to vector<1x96xf32>
    %cst_74 = arith.constant dense<0.000000e+00> : vector<8xf32>
    %251 = vector.multi_reduction <add>, %233, %cst_74 [1] : vector<8x32xf32> to vector<8xf32>
    %252 = vector.shape_cast %251 : vector<8xf32> to vector<8x1xf32>
    %cst_75 = arith.constant 3.200000e+01 : f32
    %253 = vector.broadcast %cst_75 : f32 to vector<8x1xf32>
    %254 = arith.divf %252, %253 : vector<8x1xf32>
    %255 = vector.broadcast %254 : vector<8x1xf32> to vector<8x32xf32>
    %256 = arith.subf %233, %255 : vector<8x32xf32>
    %257 = vector.broadcast %254 : vector<8x1xf32> to vector<8x32xf32>
    %258 = arith.subf %233, %257 : vector<8x32xf32>
    %259 = arith.mulf %256, %258 : vector<8x32xf32>
    %cst_76 = arith.constant dense<0.000000e+00> : vector<8xf32>
    %260 = vector.multi_reduction <add>, %259, %cst_76 [1] : vector<8x32xf32> to vector<8xf32>
    %261 = vector.shape_cast %260 : vector<8xf32> to vector<8x1xf32>
    %cst_77 = arith.constant 3.200000e+01 : f32
    %262 = vector.broadcast %cst_77 : f32 to vector<8x1xf32>
    %263 = arith.divf %261, %262 : vector<8x1xf32>
    %264 = vector.broadcast %254 : vector<8x1xf32> to vector<8x32xf32>
    %265 = arith.subf %233, %264 : vector<8x32xf32>
    %cst_78 = arith.constant 9.99999997E-7 : f32
    %266 = vector.broadcast %cst_78 : f32 to vector<8x1xf32>
    %267 = arith.addf %263, %266 : vector<8x1xf32>
    %268 = math.rsqrt %267 : vector<8x1xf32>
    %269 = vector.broadcast %268 : vector<8x1xf32> to vector<8x32xf32>
    %270 = arith.mulf %265, %269 : vector<8x32xf32>
    %271 = vector.broadcast %243 : vector<1x32xf32> to vector<8x32xf32>
    %272 = arith.mulf %270, %271 : vector<8x32xf32>
    %273 = vector.broadcast %244 : vector<1x32xf32> to vector<8x32xf32>
    %274 = arith.addf %272, %273 : vector<8x32xf32>
    %275 = arith.truncf %274 : vector<8x32xf32> to vector<8x32xbf16>
    %cst_79 = arith.constant dense<0.000000e+00> : vector<8x96xf32>
    %276 = tpu.matmul %275, %236, %cst_79 {dimension_numbers = #tpu.dot_dimension_numbers<[1], [0], [0], [1], [0, 0, 1, 1], [], []>} : vector<8x32xbf16>, vector<32x96xbf16>, vector<8x96xf32> -> vector<8x96xf32>
    %277 = vector.broadcast %250 : vector<1x96xf32> to vector<8x96xf32>
    %278 = arith.addf %276, %277 : vector<8x96xf32>
    %279 = vector.extract_strided_slice %278 {offsets = [0, 0], sizes = [8, 8], strides = [1, 1]} : vector<8x96xf32> to vector<8x8xf32>
    %280 = arith.truncf %279 : vector<8x8xf32> to vector<8x8xbf16>
    %281 = vector.extract_strided_slice %278 {offsets = [0, 32], sizes = [8, 8], strides = [1, 1]} : vector<8x96xf32> to vector<8x8xf32>
    %282 = arith.truncf %281 : vector<8x8xf32> to vector<8x8xbf16>
    %283 = vector.extract_strided_slice %278 {offsets = [0, 64], sizes = [8, 8], strides = [1, 1]} : vector<8x96xf32> to vector<8x8xf32>
    %284 = arith.truncf %283 : vector<8x8xf32> to vector<8x8xbf16>
    %cst_80 = arith.constant dense<0.000000e+00> : vector<8x8xf32>
    %285 = tpu.matmul %280, %282, %cst_80 {dimension_numbers = #tpu.dot_dimension_numbers<[1], [1], [0], [0], [0, 0, 1, 0], [], []>} : vector<8x8xbf16>, vector<8x8xbf16>, vector<8x8xf32> -> vector<8x8xf32>
    %286 = vector.broadcast %11 : vector<1x8xf32> to vector<8x8xf32>
    %287 = arith.addf %285, %286 : vector<8x8xf32>
    %cst_81 = arith.constant dense<0xFF800000> : vector<8xf32>
    %288 = vector.multi_reduction <maximumf>, %287, %cst_81 [1] : vector<8x8xf32> to vector<8xf32>
    %289 = vector.shape_cast %288 : vector<8xf32> to vector<8x1xf32>
    %290 = vector.broadcast %289 : vector<8x1xf32> to vector<8x8xf32>
    %291 = arith.subf %287, %290 : vector<8x8xf32>
    %292 = math.exp %291 : vector<8x8xf32>
    %cst_82 = arith.constant dense<0.000000e+00> : vector<8xf32>
    %293 = vector.multi_reduction <add>, %292, %cst_82 [1] : vector<8x8xf32> to vector<8xf32>
    %294 = vector.shape_cast %293 : vector<8xf32> to vector<8x1xf32>
    %295 = tpu.reciprocal %294 {approx = true} : vector<8x1xf32> -> vector<8x1xf32>
    %296 = vector.broadcast %295 : vector<8x1xf32> to vector<8x8xf32>
    %297 = arith.mulf %292, %296 : vector<8x8xf32>
    %298 = arith.truncf %297 : vector<8x8xf32> to vector<8x8xbf16>
    %cst_83 = arith.constant dense<0.000000e+00> : vector<8x8xf32>
    %299 = tpu.matmul %298, %284, %cst_83 {dimension_numbers = #tpu.dot_dimension_numbers<[1], [0], [0], [1], [0, 0, 1, 1], [], []>} : vector<8x8xbf16>, vector<8x8xbf16>, vector<8x8xf32> -> vector<8x8xf32>
    %300 = vector.extract_strided_slice %278 {offsets = [0, 8], sizes = [8, 8], strides = [1, 1]} : vector<8x96xf32> to vector<8x8xf32>
    %301 = arith.truncf %300 : vector<8x8xf32> to vector<8x8xbf16>
    %302 = vector.extract_strided_slice %278 {offsets = [0, 40], sizes = [8, 8], strides = [1, 1]} : vector<8x96xf32> to vector<8x8xf32>
    %303 = arith.truncf %302 : vector<8x8xf32> to vector<8x8xbf16>
    %304 = vector.extract_strided_slice %278 {offsets = [0, 72], sizes = [8, 8], strides = [1, 1]} : vector<8x96xf32> to vector<8x8xf32>
    %305 = arith.truncf %304 : vector<8x8xf32> to vector<8x8xbf16>
    %cst_84 = arith.constant dense<0.000000e+00> : vector<8x8xf32>
    %306 = tpu.matmul %301, %303, %cst_84 {dimension_numbers = #tpu.dot_dimension_numbers<[1], [1], [0], [0], [0, 0, 1, 0], [], []>} : vector<8x8xbf16>, vector<8x8xbf16>, vector<8x8xf32> -> vector<8x8xf32>
    %307 = vector.broadcast %11 : vector<1x8xf32> to vector<8x8xf32>
    %308 = arith.addf %306, %307 : vector<8x8xf32>
    %cst_85 = arith.constant dense<0xFF800000> : vector<8xf32>
    %309 = vector.multi_reduction <maximumf>, %308, %cst_85 [1] : vector<8x8xf32> to vector<8xf32>
    %310 = vector.shape_cast %309 : vector<8xf32> to vector<8x1xf32>
    %311 = vector.broadcast %310 : vector<8x1xf32> to vector<8x8xf32>
    %312 = arith.subf %308, %311 : vector<8x8xf32>
    %313 = math.exp %312 : vector<8x8xf32>
    %cst_86 = arith.constant dense<0.000000e+00> : vector<8xf32>
    %314 = vector.multi_reduction <add>, %313, %cst_86 [1] : vector<8x8xf32> to vector<8xf32>
    %315 = vector.shape_cast %314 : vector<8xf32> to vector<8x1xf32>
    %316 = tpu.reciprocal %315 {approx = true} : vector<8x1xf32> -> vector<8x1xf32>
    %317 = vector.broadcast %316 : vector<8x1xf32> to vector<8x8xf32>
    %318 = arith.mulf %313, %317 : vector<8x8xf32>
    %319 = arith.truncf %318 : vector<8x8xf32> to vector<8x8xbf16>
    %cst_87 = arith.constant dense<0.000000e+00> : vector<8x8xf32>
    %320 = tpu.matmul %319, %305, %cst_87 {dimension_numbers = #tpu.dot_dimension_numbers<[1], [0], [0], [1], [0, 0, 1, 1], [], []>} : vector<8x8xbf16>, vector<8x8xbf16>, vector<8x8xf32> -> vector<8x8xf32>
    %321 = vector.extract_strided_slice %278 {offsets = [0, 16], sizes = [8, 8], strides = [1, 1]} : vector<8x96xf32> to vector<8x8xf32>
    %322 = arith.truncf %321 : vector<8x8xf32> to vector<8x8xbf16>
    %323 = vector.extract_strided_slice %278 {offsets = [0, 48], sizes = [8, 8], strides = [1, 1]} : vector<8x96xf32> to vector<8x8xf32>
    %324 = arith.truncf %323 : vector<8x8xf32> to vector<8x8xbf16>
    %325 = vector.extract_strided_slice %278 {offsets = [0, 80], sizes = [8, 8], strides = [1, 1]} : vector<8x96xf32> to vector<8x8xf32>
    %326 = arith.truncf %325 : vector<8x8xf32> to vector<8x8xbf16>
    %cst_88 = arith.constant dense<0.000000e+00> : vector<8x8xf32>
    %327 = tpu.matmul %322, %324, %cst_88 {dimension_numbers = #tpu.dot_dimension_numbers<[1], [1], [0], [0], [0, 0, 1, 0], [], []>} : vector<8x8xbf16>, vector<8x8xbf16>, vector<8x8xf32> -> vector<8x8xf32>
    %328 = vector.broadcast %11 : vector<1x8xf32> to vector<8x8xf32>
    %329 = arith.addf %327, %328 : vector<8x8xf32>
    %cst_89 = arith.constant dense<0xFF800000> : vector<8xf32>
    %330 = vector.multi_reduction <maximumf>, %329, %cst_89 [1] : vector<8x8xf32> to vector<8xf32>
    %331 = vector.shape_cast %330 : vector<8xf32> to vector<8x1xf32>
    %332 = vector.broadcast %331 : vector<8x1xf32> to vector<8x8xf32>
    %333 = arith.subf %329, %332 : vector<8x8xf32>
    %334 = math.exp %333 : vector<8x8xf32>
    %cst_90 = arith.constant dense<0.000000e+00> : vector<8xf32>
    %335 = vector.multi_reduction <add>, %334, %cst_90 [1] : vector<8x8xf32> to vector<8xf32>
    %336 = vector.shape_cast %335 : vector<8xf32> to vector<8x1xf32>
    %337 = tpu.reciprocal %336 {approx = true} : vector<8x1xf32> -> vector<8x1xf32>
    %338 = vector.broadcast %337 : vector<8x1xf32> to vector<8x8xf32>
    %339 = arith.mulf %334, %338 : vector<8x8xf32>
    %340 = arith.truncf %339 : vector<8x8xf32> to vector<8x8xbf16>
    %cst_91 = arith.constant dense<0.000000e+00> : vector<8x8xf32>
    %341 = tpu.matmul %340, %326, %cst_91 {dimension_numbers = #tpu.dot_dimension_numbers<[1], [0], [0], [1], [0, 0, 1, 1], [], []>} : vector<8x8xbf16>, vector<8x8xbf16>, vector<8x8xf32> -> vector<8x8xf32>
    %342 = vector.extract_strided_slice %278 {offsets = [0, 24], sizes = [8, 8], strides = [1, 1]} : vector<8x96xf32> to vector<8x8xf32>
    %343 = arith.truncf %342 : vector<8x8xf32> to vector<8x8xbf16>
    %344 = vector.extract_strided_slice %278 {offsets = [0, 56], sizes = [8, 8], strides = [1, 1]} : vector<8x96xf32> to vector<8x8xf32>
    %345 = arith.truncf %344 : vector<8x8xf32> to vector<8x8xbf16>
    %346 = vector.extract_strided_slice %278 {offsets = [0, 88], sizes = [8, 8], strides = [1, 1]} : vector<8x96xf32> to vector<8x8xf32>
    %347 = arith.truncf %346 : vector<8x8xf32> to vector<8x8xbf16>
    %cst_92 = arith.constant dense<0.000000e+00> : vector<8x8xf32>
    %348 = tpu.matmul %343, %345, %cst_92 {dimension_numbers = #tpu.dot_dimension_numbers<[1], [1], [0], [0], [0, 0, 1, 0], [], []>} : vector<8x8xbf16>, vector<8x8xbf16>, vector<8x8xf32> -> vector<8x8xf32>
    %349 = vector.broadcast %11 : vector<1x8xf32> to vector<8x8xf32>
    %350 = arith.addf %348, %349 : vector<8x8xf32>
    %cst_93 = arith.constant dense<0xFF800000> : vector<8xf32>
    %351 = vector.multi_reduction <maximumf>, %350, %cst_93 [1] : vector<8x8xf32> to vector<8xf32>
    %352 = vector.shape_cast %351 : vector<8xf32> to vector<8x1xf32>
    %353 = vector.broadcast %352 : vector<8x1xf32> to vector<8x8xf32>
    %354 = arith.subf %350, %353 : vector<8x8xf32>
    %355 = math.exp %354 : vector<8x8xf32>
    %cst_94 = arith.constant dense<0.000000e+00> : vector<8xf32>
    %356 = vector.multi_reduction <add>, %355, %cst_94 [1] : vector<8x8xf32> to vector<8xf32>
    %357 = vector.shape_cast %356 : vector<8xf32> to vector<8x1xf32>
    %358 = tpu.reciprocal %357 {approx = true} : vector<8x1xf32> -> vector<8x1xf32>
    %359 = vector.broadcast %358 : vector<8x1xf32> to vector<8x8xf32>
    %360 = arith.mulf %355, %359 : vector<8x8xf32>
    %361 = arith.truncf %360 : vector<8x8xf32> to vector<8x8xbf16>
    %cst_95 = arith.constant dense<0.000000e+00> : vector<8x8xf32>
    %362 = tpu.matmul %361, %347, %cst_95 {dimension_numbers = #tpu.dot_dimension_numbers<[1], [0], [0], [1], [0, 0, 1, 1], [], []>} : vector<8x8xbf16>, vector<8x8xbf16>, vector<8x8xf32> -> vector<8x8xf32>
    %363 = tpu.concatenate %299, %320, %341, %362 in 1 : vector<8x8xf32>, vector<8x8xf32>, vector<8x8xf32>, vector<8x8xf32> -> vector<8x32xf32>
    %364 = arith.truncf %363 : vector<8x32xf32> to vector<8x32xbf16>
    %cst_96 = arith.constant dense<0.000000e+00> : vector<8x32xf32>
    %365 = tpu.matmul %364, %237, %cst_96 {dimension_numbers = #tpu.dot_dimension_numbers<[1], [0], [0], [1], [0, 0, 1, 1], [], []>} : vector<8x32xbf16>, vector<32x32xbf16>, vector<8x32xf32> -> vector<8x32xf32>
    %366 = vector.broadcast %247 : vector<1x32xf32> to vector<8x32xf32>
    %367 = arith.addf %365, %366 : vector<8x32xf32>
    %368 = arith.addf %233, %367 : vector<8x32xf32>
    %cst_97 = arith.constant dense<0.000000e+00> : vector<8xf32>
    %369 = vector.multi_reduction <add>, %368, %cst_97 [1] : vector<8x32xf32> to vector<8xf32>
    %370 = vector.shape_cast %369 : vector<8xf32> to vector<8x1xf32>
    %cst_98 = arith.constant 3.200000e+01 : f32
    %371 = vector.broadcast %cst_98 : f32 to vector<8x1xf32>
    %372 = arith.divf %370, %371 : vector<8x1xf32>
    %373 = vector.broadcast %372 : vector<8x1xf32> to vector<8x32xf32>
    %374 = arith.subf %368, %373 : vector<8x32xf32>
    %375 = vector.broadcast %372 : vector<8x1xf32> to vector<8x32xf32>
    %376 = arith.subf %368, %375 : vector<8x32xf32>
    %377 = arith.mulf %374, %376 : vector<8x32xf32>
    %cst_99 = arith.constant dense<0.000000e+00> : vector<8xf32>
    %378 = vector.multi_reduction <add>, %377, %cst_99 [1] : vector<8x32xf32> to vector<8xf32>
    %379 = vector.shape_cast %378 : vector<8xf32> to vector<8x1xf32>
    %cst_100 = arith.constant 3.200000e+01 : f32
    %380 = vector.broadcast %cst_100 : f32 to vector<8x1xf32>
    %381 = arith.divf %379, %380 : vector<8x1xf32>
    %382 = vector.broadcast %372 : vector<8x1xf32> to vector<8x32xf32>
    %383 = arith.subf %368, %382 : vector<8x32xf32>
    %cst_101 = arith.constant 9.99999997E-7 : f32
    %384 = vector.broadcast %cst_101 : f32 to vector<8x1xf32>
    %385 = arith.addf %381, %384 : vector<8x1xf32>
    %386 = math.rsqrt %385 : vector<8x1xf32>
    %387 = vector.broadcast %386 : vector<8x1xf32> to vector<8x32xf32>
    %388 = arith.mulf %383, %387 : vector<8x32xf32>
    %389 = vector.broadcast %245 : vector<1x32xf32> to vector<8x32xf32>
    %390 = arith.mulf %388, %389 : vector<8x32xf32>
    %391 = vector.broadcast %246 : vector<1x32xf32> to vector<8x32xf32>
    %392 = arith.addf %390, %391 : vector<8x32xf32>
    %393 = arith.truncf %392 : vector<8x32xf32> to vector<8x32xbf16>
    %cst_102 = arith.constant dense<0.000000e+00> : vector<8x128xf32>
    %394 = tpu.matmul %393, %238, %cst_102 {dimension_numbers = #tpu.dot_dimension_numbers<[1], [0], [0], [1], [0, 0, 1, 1], [], []>} : vector<8x32xbf16>, vector<32x128xbf16>, vector<8x128xf32> -> vector<8x128xf32>
    %395 = vector.broadcast %249 : vector<1x128xf32> to vector<8x128xf32>
    %396 = arith.addf %394, %395 : vector<8x128xf32>
    %cst_103 = arith.constant 5.000000e-01 : f32
    %397 = vector.broadcast %cst_103 : f32 to vector<8x128xf32>
    %398 = arith.mulf %397, %396 : vector<8x128xf32>
    %cst_104 = arith.constant 0.707106769 : f32
    %399 = vector.broadcast %cst_104 : f32 to vector<8x128xf32>
    %400 = arith.mulf %396, %399 : vector<8x128xf32>
    %401 = math.absf %400 : vector<8x128xf32>
    %cst_105 = arith.constant 5.000000e-01 : f32
    %402 = vector.broadcast %cst_105 : f32 to vector<8x128xf32>
    %403 = arith.mulf %402, %401 : vector<8x128xf32>
    %cst_106 = arith.constant 1.000000e+00 : f32
    %404 = vector.broadcast %cst_106 : f32 to vector<8x128xf32>
    %405 = arith.addf %404, %403 : vector<8x128xf32>
    %406 = tpu.reciprocal %405 {approx = true} : vector<8x128xf32> -> vector<8x128xf32>
    %cst_107 = arith.constant 0.170872763 : f32
    %407 = vector.broadcast %cst_107 : f32 to vector<8x128xf32>
    %408 = arith.mulf %406, %407 : vector<8x128xf32>
    %cst_108 = arith.constant -0.822152256 : f32
    %409 = vector.broadcast %cst_108 : f32 to vector<8x128xf32>
    %410 = arith.addf %409, %408 : vector<8x128xf32>
    %411 = arith.mulf %406, %410 : vector<8x128xf32>
    %cst_109 = arith.constant 1.48851585 : f32
    %412 = vector.broadcast %cst_109 : f32 to vector<8x128xf32>
    %413 = arith.addf %412, %411 : vector<8x128xf32>
    %414 = arith.mulf %406, %413 : vector<8x128xf32>
    %cst_110 = arith.constant -1.13520396 : f32
    %415 = vector.broadcast %cst_110 : f32 to vector<8x128xf32>
    %416 = arith.addf %415, %414 : vector<8x128xf32>
    %417 = arith.mulf %406, %416 : vector<8x128xf32>
    %cst_111 = arith.constant 0.278868079 : f32
    %418 = vector.broadcast %cst_111 : f32 to vector<8x128xf32>
    %419 = arith.addf %418, %417 : vector<8x128xf32>
    %420 = arith.mulf %406, %419 : vector<8x128xf32>
    %cst_112 = arith.constant -0.186288059 : f32
    %421 = vector.broadcast %cst_112 : f32 to vector<8x128xf32>
    %422 = arith.addf %421, %420 : vector<8x128xf32>
    %423 = arith.mulf %406, %422 : vector<8x128xf32>
    %cst_113 = arith.constant 0.0967841818 : f32
    %424 = vector.broadcast %cst_113 : f32 to vector<8x128xf32>
    %425 = arith.addf %424, %423 : vector<8x128xf32>
    %426 = arith.mulf %406, %425 : vector<8x128xf32>
    %cst_114 = arith.constant 0.374091953 : f32
    %427 = vector.broadcast %cst_114 : f32 to vector<8x128xf32>
    %428 = arith.addf %427, %426 : vector<8x128xf32>
    %429 = arith.mulf %406, %428 : vector<8x128xf32>
    %cst_115 = arith.constant 1.00002372 : f32
    %430 = vector.broadcast %cst_115 : f32 to vector<8x128xf32>
    %431 = arith.addf %430, %429 : vector<8x128xf32>
    %432 = arith.mulf %406, %431 : vector<8x128xf32>
    %cst_116 = arith.constant -1.26551223 : f32
    %433 = vector.broadcast %cst_116 : f32 to vector<8x128xf32>
    %434 = arith.addf %433, %432 : vector<8x128xf32>
    %cst_117 = arith.constant 0.000000e+00 : f32
    %435 = vector.broadcast %cst_117 : f32 to vector<8x128xf32>
    %436 = arith.subf %435, %401 : vector<8x128xf32>
    %437 = arith.mulf %436, %401 : vector<8x128xf32>
    %438 = arith.addf %437, %434 : vector<8x128xf32>
    %439 = math.exp %438 : vector<8x128xf32>
    %440 = arith.mulf %406, %439 : vector<8x128xf32>
    %cst_118 = arith.constant 0.000000e+00 : f32
    %441 = vector.broadcast %cst_118 : f32 to vector<8x128xf32>
    %442 = arith.cmpf oge, %400, %441 : vector<8x128xf32>
    %cst_119 = arith.constant 1.000000e+00 : f32
    %443 = vector.broadcast %cst_119 : f32 to vector<8x128xf32>
    %444 = arith.subf %443, %440 : vector<8x128xf32>
    %cst_120 = arith.constant 1.000000e+00 : f32
    %445 = vector.broadcast %cst_120 : f32 to vector<8x128xf32>
    %446 = arith.subf %440, %445 : vector<8x128xf32>
    %447 = arith.select %442, %444, %446 : vector<8x128xi1>, vector<8x128xf32>
    %cst_121 = arith.constant 1.000000e+00 : f32
    %448 = vector.broadcast %cst_121 : f32 to vector<8x128xf32>
    %449 = arith.addf %448, %447 : vector<8x128xf32>
    %450 = arith.mulf %398, %449 : vector<8x128xf32>
    %451 = arith.truncf %450 : vector<8x128xf32> to vector<8x128xbf16>
    %cst_122 = arith.constant dense<0.000000e+00> : vector<8x32xf32>
    %452 = tpu.matmul %451, %240, %cst_122 {dimension_numbers = #tpu.dot_dimension_numbers<[1], [0], [0], [1], [0, 0, 1, 1], [], []>} : vector<8x128xbf16>, vector<128x32xbf16>, vector<8x32xf32> -> vector<8x32xf32>
    %453 = vector.broadcast %248 : vector<1x32xf32> to vector<8x32xf32>
    %454 = arith.addf %452, %453 : vector<8x32xf32>
    %455 = arith.addf %368, %454 : vector<8x32xf32>
    %c2 = arith.constant 2 : index
    %c0_123 = arith.constant 0 : index
    %c0_124 = arith.constant 0 : index
    %456 = vector.load %arg4[%c2, %c0_123, %c0_124] : memref<3x32x256xbf16, #tpu.memory_space<vmem>>, vector<1x32x256xbf16>
    %457 = vector.shape_cast %456 : vector<1x32x256xbf16> to vector<32x256xbf16>
    %458 = vector.extract_strided_slice %457 {offsets = [0, 0], sizes = [32, 96], strides = [1, 1]} : vector<32x256xbf16> to vector<32x96xbf16>
    %459 = vector.extract_strided_slice %457 {offsets = [0, 96], sizes = [32, 32], strides = [1, 1]} : vector<32x256xbf16> to vector<32x32xbf16>
    %460 = vector.extract_strided_slice %457 {offsets = [0, 128], sizes = [32, 128], strides = [1, 1]} : vector<32x256xbf16> to vector<32x128xbf16>
    %c2_125 = arith.constant 2 : index
    %c0_126 = arith.constant 0 : index
    %c0_127 = arith.constant 0 : index
    %461 = vector.load %arg5[%c2_125, %c0_126, %c0_127] : memref<3x128x32xbf16, #tpu.memory_space<vmem>>, vector<1x128x32xbf16>
    %462 = vector.shape_cast %461 : vector<1x128x32xbf16> to vector<128x32xbf16>
    %c2_128 = arith.constant 2 : index
    %c0_129 = arith.constant 0 : index
    %c0_130 = arith.constant 0 : index
    %463 = vector.load %arg6[%c2_128, %c0_129, %c0_130] : memref<3x8x128xf32, #tpu.memory_space<vmem>>, vector<1x8x128xf32>
    %464 = vector.shape_cast %463 : vector<1x8x128xf32> to vector<8x128xf32>
    %465 = vector.extract_strided_slice %464 {offsets = [0, 0], sizes = [1, 32], strides = [1, 1]} : vector<8x128xf32> to vector<1x32xf32>
    %466 = vector.extract_strided_slice %464 {offsets = [1, 0], sizes = [1, 32], strides = [1, 1]} : vector<8x128xf32> to vector<1x32xf32>
    %467 = vector.extract_strided_slice %464 {offsets = [2, 0], sizes = [1, 32], strides = [1, 1]} : vector<8x128xf32> to vector<1x32xf32>
    %468 = vector.extract_strided_slice %464 {offsets = [3, 0], sizes = [1, 32], strides = [1, 1]} : vector<8x128xf32> to vector<1x32xf32>
    %469 = vector.extract_strided_slice %464 {offsets = [4, 0], sizes = [1, 32], strides = [1, 1]} : vector<8x128xf32> to vector<1x32xf32>
    %470 = vector.extract_strided_slice %464 {offsets = [5, 0], sizes = [1, 32], strides = [1, 1]} : vector<8x128xf32> to vector<1x32xf32>
    %471 = vector.extract_strided_slice %464 {offsets = [6, 0], sizes = [1, 128], strides = [1, 1]} : vector<8x128xf32> to vector<1x128xf32>
    %472 = vector.extract_strided_slice %464 {offsets = [7, 0], sizes = [1, 96], strides = [1, 1]} : vector<8x128xf32> to vector<1x96xf32>
    %cst_131 = arith.constant dense<0.000000e+00> : vector<8xf32>
    %473 = vector.multi_reduction <add>, %455, %cst_131 [1] : vector<8x32xf32> to vector<8xf32>
    %474 = vector.shape_cast %473 : vector<8xf32> to vector<8x1xf32>
    %cst_132 = arith.constant 3.200000e+01 : f32
    %475 = vector.broadcast %cst_132 : f32 to vector<8x1xf32>
    %476 = arith.divf %474, %475 : vector<8x1xf32>
    %477 = vector.broadcast %476 : vector<8x1xf32> to vector<8x32xf32>
    %478 = arith.subf %455, %477 : vector<8x32xf32>
    %479 = vector.broadcast %476 : vector<8x1xf32> to vector<8x32xf32>
    %480 = arith.subf %455, %479 : vector<8x32xf32>
    %481 = arith.mulf %478, %480 : vector<8x32xf32>
    %cst_133 = arith.constant dense<0.000000e+00> : vector<8xf32>
    %482 = vector.multi_reduction <add>, %481, %cst_133 [1] : vector<8x32xf32> to vector<8xf32>
    %483 = vector.shape_cast %482 : vector<8xf32> to vector<8x1xf32>
    %cst_134 = arith.constant 3.200000e+01 : f32
    %484 = vector.broadcast %cst_134 : f32 to vector<8x1xf32>
    %485 = arith.divf %483, %484 : vector<8x1xf32>
    %486 = vector.broadcast %476 : vector<8x1xf32> to vector<8x32xf32>
    %487 = arith.subf %455, %486 : vector<8x32xf32>
    %cst_135 = arith.constant 9.99999997E-7 : f32
    %488 = vector.broadcast %cst_135 : f32 to vector<8x1xf32>
    %489 = arith.addf %485, %488 : vector<8x1xf32>
    %490 = math.rsqrt %489 : vector<8x1xf32>
    %491 = vector.broadcast %490 : vector<8x1xf32> to vector<8x32xf32>
    %492 = arith.mulf %487, %491 : vector<8x32xf32>
    %493 = vector.broadcast %465 : vector<1x32xf32> to vector<8x32xf32>
    %494 = arith.mulf %492, %493 : vector<8x32xf32>
    %495 = vector.broadcast %466 : vector<1x32xf32> to vector<8x32xf32>
    %496 = arith.addf %494, %495 : vector<8x32xf32>
    %497 = arith.truncf %496 : vector<8x32xf32> to vector<8x32xbf16>
    %cst_136 = arith.constant dense<0.000000e+00> : vector<8x96xf32>
    %498 = tpu.matmul %497, %458, %cst_136 {dimension_numbers = #tpu.dot_dimension_numbers<[1], [0], [0], [1], [0, 0, 1, 1], [], []>} : vector<8x32xbf16>, vector<32x96xbf16>, vector<8x96xf32> -> vector<8x96xf32>
    %499 = vector.broadcast %472 : vector<1x96xf32> to vector<8x96xf32>
    %500 = arith.addf %498, %499 : vector<8x96xf32>
    %501 = vector.extract_strided_slice %500 {offsets = [0, 0], sizes = [8, 8], strides = [1, 1]} : vector<8x96xf32> to vector<8x8xf32>
    %502 = arith.truncf %501 : vector<8x8xf32> to vector<8x8xbf16>
    %503 = vector.extract_strided_slice %500 {offsets = [0, 32], sizes = [8, 8], strides = [1, 1]} : vector<8x96xf32> to vector<8x8xf32>
    %504 = arith.truncf %503 : vector<8x8xf32> to vector<8x8xbf16>
    %505 = vector.extract_strided_slice %500 {offsets = [0, 64], sizes = [8, 8], strides = [1, 1]} : vector<8x96xf32> to vector<8x8xf32>
    %506 = arith.truncf %505 : vector<8x8xf32> to vector<8x8xbf16>
    %cst_137 = arith.constant dense<0.000000e+00> : vector<8x8xf32>
    %507 = tpu.matmul %502, %504, %cst_137 {dimension_numbers = #tpu.dot_dimension_numbers<[1], [1], [0], [0], [0, 0, 1, 0], [], []>} : vector<8x8xbf16>, vector<8x8xbf16>, vector<8x8xf32> -> vector<8x8xf32>
    %508 = vector.broadcast %11 : vector<1x8xf32> to vector<8x8xf32>
    %509 = arith.addf %507, %508 : vector<8x8xf32>
    %cst_138 = arith.constant dense<0xFF800000> : vector<8xf32>
    %510 = vector.multi_reduction <maximumf>, %509, %cst_138 [1] : vector<8x8xf32> to vector<8xf32>
    %511 = vector.shape_cast %510 : vector<8xf32> to vector<8x1xf32>
    %512 = vector.broadcast %511 : vector<8x1xf32> to vector<8x8xf32>
    %513 = arith.subf %509, %512 : vector<8x8xf32>
    %514 = math.exp %513 : vector<8x8xf32>
    %cst_139 = arith.constant dense<0.000000e+00> : vector<8xf32>
    %515 = vector.multi_reduction <add>, %514, %cst_139 [1] : vector<8x8xf32> to vector<8xf32>
    %516 = vector.shape_cast %515 : vector<8xf32> to vector<8x1xf32>
    %517 = tpu.reciprocal %516 {approx = true} : vector<8x1xf32> -> vector<8x1xf32>
    %518 = vector.broadcast %517 : vector<8x1xf32> to vector<8x8xf32>
    %519 = arith.mulf %514, %518 : vector<8x8xf32>
    %520 = arith.truncf %519 : vector<8x8xf32> to vector<8x8xbf16>
    %cst_140 = arith.constant dense<0.000000e+00> : vector<8x8xf32>
    %521 = tpu.matmul %520, %506, %cst_140 {dimension_numbers = #tpu.dot_dimension_numbers<[1], [0], [0], [1], [0, 0, 1, 1], [], []>} : vector<8x8xbf16>, vector<8x8xbf16>, vector<8x8xf32> -> vector<8x8xf32>
    %522 = vector.extract_strided_slice %500 {offsets = [0, 8], sizes = [8, 8], strides = [1, 1]} : vector<8x96xf32> to vector<8x8xf32>
    %523 = arith.truncf %522 : vector<8x8xf32> to vector<8x8xbf16>
    %524 = vector.extract_strided_slice %500 {offsets = [0, 40], sizes = [8, 8], strides = [1, 1]} : vector<8x96xf32> to vector<8x8xf32>
    %525 = arith.truncf %524 : vector<8x8xf32> to vector<8x8xbf16>
    %526 = vector.extract_strided_slice %500 {offsets = [0, 72], sizes = [8, 8], strides = [1, 1]} : vector<8x96xf32> to vector<8x8xf32>
    %527 = arith.truncf %526 : vector<8x8xf32> to vector<8x8xbf16>
    %cst_141 = arith.constant dense<0.000000e+00> : vector<8x8xf32>
    %528 = tpu.matmul %523, %525, %cst_141 {dimension_numbers = #tpu.dot_dimension_numbers<[1], [1], [0], [0], [0, 0, 1, 0], [], []>} : vector<8x8xbf16>, vector<8x8xbf16>, vector<8x8xf32> -> vector<8x8xf32>
    %529 = vector.broadcast %11 : vector<1x8xf32> to vector<8x8xf32>
    %530 = arith.addf %528, %529 : vector<8x8xf32>
    %cst_142 = arith.constant dense<0xFF800000> : vector<8xf32>
    %531 = vector.multi_reduction <maximumf>, %530, %cst_142 [1] : vector<8x8xf32> to vector<8xf32>
    %532 = vector.shape_cast %531 : vector<8xf32> to vector<8x1xf32>
    %533 = vector.broadcast %532 : vector<8x1xf32> to vector<8x8xf32>
    %534 = arith.subf %530, %533 : vector<8x8xf32>
    %535 = math.exp %534 : vector<8x8xf32>
    %cst_143 = arith.constant dense<0.000000e+00> : vector<8xf32>
    %536 = vector.multi_reduction <add>, %535, %cst_143 [1] : vector<8x8xf32> to vector<8xf32>
    %537 = vector.shape_cast %536 : vector<8xf32> to vector<8x1xf32>
    %538 = tpu.reciprocal %537 {approx = true} : vector<8x1xf32> -> vector<8x1xf32>
    %539 = vector.broadcast %538 : vector<8x1xf32> to vector<8x8xf32>
    %540 = arith.mulf %535, %539 : vector<8x8xf32>
    %541 = arith.truncf %540 : vector<8x8xf32> to vector<8x8xbf16>
    %cst_144 = arith.constant dense<0.000000e+00> : vector<8x8xf32>
    %542 = tpu.matmul %541, %527, %cst_144 {dimension_numbers = #tpu.dot_dimension_numbers<[1], [0], [0], [1], [0, 0, 1, 1], [], []>} : vector<8x8xbf16>, vector<8x8xbf16>, vector<8x8xf32> -> vector<8x8xf32>
    %543 = vector.extract_strided_slice %500 {offsets = [0, 16], sizes = [8, 8], strides = [1, 1]} : vector<8x96xf32> to vector<8x8xf32>
    %544 = arith.truncf %543 : vector<8x8xf32> to vector<8x8xbf16>
    %545 = vector.extract_strided_slice %500 {offsets = [0, 48], sizes = [8, 8], strides = [1, 1]} : vector<8x96xf32> to vector<8x8xf32>
    %546 = arith.truncf %545 : vector<8x8xf32> to vector<8x8xbf16>
    %547 = vector.extract_strided_slice %500 {offsets = [0, 80], sizes = [8, 8], strides = [1, 1]} : vector<8x96xf32> to vector<8x8xf32>
    %548 = arith.truncf %547 : vector<8x8xf32> to vector<8x8xbf16>
    %cst_145 = arith.constant dense<0.000000e+00> : vector<8x8xf32>
    %549 = tpu.matmul %544, %546, %cst_145 {dimension_numbers = #tpu.dot_dimension_numbers<[1], [1], [0], [0], [0, 0, 1, 0], [], []>} : vector<8x8xbf16>, vector<8x8xbf16>, vector<8x8xf32> -> vector<8x8xf32>
    %550 = vector.broadcast %11 : vector<1x8xf32> to vector<8x8xf32>
    %551 = arith.addf %549, %550 : vector<8x8xf32>
    %cst_146 = arith.constant dense<0xFF800000> : vector<8xf32>
    %552 = vector.multi_reduction <maximumf>, %551, %cst_146 [1] : vector<8x8xf32> to vector<8xf32>
    %553 = vector.shape_cast %552 : vector<8xf32> to vector<8x1xf32>
    %554 = vector.broadcast %553 : vector<8x1xf32> to vector<8x8xf32>
    %555 = arith.subf %551, %554 : vector<8x8xf32>
    %556 = math.exp %555 : vector<8x8xf32>
    %cst_147 = arith.constant dense<0.000000e+00> : vector<8xf32>
    %557 = vector.multi_reduction <add>, %556, %cst_147 [1] : vector<8x8xf32> to vector<8xf32>
    %558 = vector.shape_cast %557 : vector<8xf32> to vector<8x1xf32>
    %559 = tpu.reciprocal %558 {approx = true} : vector<8x1xf32> -> vector<8x1xf32>
    %560 = vector.broadcast %559 : vector<8x1xf32> to vector<8x8xf32>
    %561 = arith.mulf %556, %560 : vector<8x8xf32>
    %562 = arith.truncf %561 : vector<8x8xf32> to vector<8x8xbf16>
    %cst_148 = arith.constant dense<0.000000e+00> : vector<8x8xf32>
    %563 = tpu.matmul %562, %548, %cst_148 {dimension_numbers = #tpu.dot_dimension_numbers<[1], [0], [0], [1], [0, 0, 1, 1], [], []>} : vector<8x8xbf16>, vector<8x8xbf16>, vector<8x8xf32> -> vector<8x8xf32>
    %564 = vector.extract_strided_slice %500 {offsets = [0, 24], sizes = [8, 8], strides = [1, 1]} : vector<8x96xf32> to vector<8x8xf32>
    %565 = arith.truncf %564 : vector<8x8xf32> to vector<8x8xbf16>
    %566 = vector.extract_strided_slice %500 {offsets = [0, 56], sizes = [8, 8], strides = [1, 1]} : vector<8x96xf32> to vector<8x8xf32>
    %567 = arith.truncf %566 : vector<8x8xf32> to vector<8x8xbf16>
    %568 = vector.extract_strided_slice %500 {offsets = [0, 88], sizes = [8, 8], strides = [1, 1]} : vector<8x96xf32> to vector<8x8xf32>
    %569 = arith.truncf %568 : vector<8x8xf32> to vector<8x8xbf16>
    %cst_149 = arith.constant dense<0.000000e+00> : vector<8x8xf32>
    %570 = tpu.matmul %565, %567, %cst_149 {dimension_numbers = #tpu.dot_dimension_numbers<[1], [1], [0], [0], [0, 0, 1, 0], [], []>} : vector<8x8xbf16>, vector<8x8xbf16>, vector<8x8xf32> -> vector<8x8xf32>
    %571 = vector.broadcast %11 : vector<1x8xf32> to vector<8x8xf32>
    %572 = arith.addf %570, %571 : vector<8x8xf32>
    %cst_150 = arith.constant dense<0xFF800000> : vector<8xf32>
    %573 = vector.multi_reduction <maximumf>, %572, %cst_150 [1] : vector<8x8xf32> to vector<8xf32>
    %574 = vector.shape_cast %573 : vector<8xf32> to vector<8x1xf32>
    %575 = vector.broadcast %574 : vector<8x1xf32> to vector<8x8xf32>
    %576 = arith.subf %572, %575 : vector<8x8xf32>
    %577 = math.exp %576 : vector<8x8xf32>
    %cst_151 = arith.constant dense<0.000000e+00> : vector<8xf32>
    %578 = vector.multi_reduction <add>, %577, %cst_151 [1] : vector<8x8xf32> to vector<8xf32>
    %579 = vector.shape_cast %578 : vector<8xf32> to vector<8x1xf32>
    %580 = tpu.reciprocal %579 {approx = true} : vector<8x1xf32> -> vector<8x1xf32>
    %581 = vector.broadcast %580 : vector<8x1xf32> to vector<8x8xf32>
    %582 = arith.mulf %577, %581 : vector<8x8xf32>
    %583 = arith.truncf %582 : vector<8x8xf32> to vector<8x8xbf16>
    %cst_152 = arith.constant dense<0.000000e+00> : vector<8x8xf32>
    %584 = tpu.matmul %583, %569, %cst_152 {dimension_numbers = #tpu.dot_dimension_numbers<[1], [0], [0], [1], [0, 0, 1, 1], [], []>} : vector<8x8xbf16>, vector<8x8xbf16>, vector<8x8xf32> -> vector<8x8xf32>
    %585 = tpu.concatenate %521, %542, %563, %584 in 1 : vector<8x8xf32>, vector<8x8xf32>, vector<8x8xf32>, vector<8x8xf32> -> vector<8x32xf32>
    %586 = arith.truncf %585 : vector<8x32xf32> to vector<8x32xbf16>
    %cst_153 = arith.constant dense<0.000000e+00> : vector<8x32xf32>
    %587 = tpu.matmul %586, %459, %cst_153 {dimension_numbers = #tpu.dot_dimension_numbers<[1], [0], [0], [1], [0, 0, 1, 1], [], []>} : vector<8x32xbf16>, vector<32x32xbf16>, vector<8x32xf32> -> vector<8x32xf32>
    %588 = vector.broadcast %469 : vector<1x32xf32> to vector<8x32xf32>
    %589 = arith.addf %587, %588 : vector<8x32xf32>
    %590 = arith.addf %455, %589 : vector<8x32xf32>
    %cst_154 = arith.constant dense<0.000000e+00> : vector<8xf32>
    %591 = vector.multi_reduction <add>, %590, %cst_154 [1] : vector<8x32xf32> to vector<8xf32>
    %592 = vector.shape_cast %591 : vector<8xf32> to vector<8x1xf32>
    %cst_155 = arith.constant 3.200000e+01 : f32
    %593 = vector.broadcast %cst_155 : f32 to vector<8x1xf32>
    %594 = arith.divf %592, %593 : vector<8x1xf32>
    %595 = vector.broadcast %594 : vector<8x1xf32> to vector<8x32xf32>
    %596 = arith.subf %590, %595 : vector<8x32xf32>
    %597 = vector.broadcast %594 : vector<8x1xf32> to vector<8x32xf32>
    %598 = arith.subf %590, %597 : vector<8x32xf32>
    %599 = arith.mulf %596, %598 : vector<8x32xf32>
    %cst_156 = arith.constant dense<0.000000e+00> : vector<8xf32>
    %600 = vector.multi_reduction <add>, %599, %cst_156 [1] : vector<8x32xf32> to vector<8xf32>
    %601 = vector.shape_cast %600 : vector<8xf32> to vector<8x1xf32>
    %cst_157 = arith.constant 3.200000e+01 : f32
    %602 = vector.broadcast %cst_157 : f32 to vector<8x1xf32>
    %603 = arith.divf %601, %602 : vector<8x1xf32>
    %604 = vector.broadcast %594 : vector<8x1xf32> to vector<8x32xf32>
    %605 = arith.subf %590, %604 : vector<8x32xf32>
    %cst_158 = arith.constant 9.99999997E-7 : f32
    %606 = vector.broadcast %cst_158 : f32 to vector<8x1xf32>
    %607 = arith.addf %603, %606 : vector<8x1xf32>
    %608 = math.rsqrt %607 : vector<8x1xf32>
    %609 = vector.broadcast %608 : vector<8x1xf32> to vector<8x32xf32>
    %610 = arith.mulf %605, %609 : vector<8x32xf32>
    %611 = vector.broadcast %467 : vector<1x32xf32> to vector<8x32xf32>
    %612 = arith.mulf %610, %611 : vector<8x32xf32>
    %613 = vector.broadcast %468 : vector<1x32xf32> to vector<8x32xf32>
    %614 = arith.addf %612, %613 : vector<8x32xf32>
    %615 = arith.truncf %614 : vector<8x32xf32> to vector<8x32xbf16>
    %cst_159 = arith.constant dense<0.000000e+00> : vector<8x128xf32>
    %616 = tpu.matmul %615, %460, %cst_159 {dimension_numbers = #tpu.dot_dimension_numbers<[1], [0], [0], [1], [0, 0, 1, 1], [], []>} : vector<8x32xbf16>, vector<32x128xbf16>, vector<8x128xf32> -> vector<8x128xf32>
    %617 = vector.broadcast %471 : vector<1x128xf32> to vector<8x128xf32>
    %618 = arith.addf %616, %617 : vector<8x128xf32>
    %cst_160 = arith.constant 5.000000e-01 : f32
    %619 = vector.broadcast %cst_160 : f32 to vector<8x128xf32>
    %620 = arith.mulf %619, %618 : vector<8x128xf32>
    %cst_161 = arith.constant 0.707106769 : f32
    %621 = vector.broadcast %cst_161 : f32 to vector<8x128xf32>
    %622 = arith.mulf %618, %621 : vector<8x128xf32>
    %623 = math.absf %622 : vector<8x128xf32>
    %cst_162 = arith.constant 5.000000e-01 : f32
    %624 = vector.broadcast %cst_162 : f32 to vector<8x128xf32>
    %625 = arith.mulf %624, %623 : vector<8x128xf32>
    %cst_163 = arith.constant 1.000000e+00 : f32
    %626 = vector.broadcast %cst_163 : f32 to vector<8x128xf32>
    %627 = arith.addf %626, %625 : vector<8x128xf32>
    %628 = tpu.reciprocal %627 {approx = true} : vector<8x128xf32> -> vector<8x128xf32>
    %cst_164 = arith.constant 0.170872763 : f32
    %629 = vector.broadcast %cst_164 : f32 to vector<8x128xf32>
    %630 = arith.mulf %628, %629 : vector<8x128xf32>
    %cst_165 = arith.constant -0.822152256 : f32
    %631 = vector.broadcast %cst_165 : f32 to vector<8x128xf32>
    %632 = arith.addf %631, %630 : vector<8x128xf32>
    %633 = arith.mulf %628, %632 : vector<8x128xf32>
    %cst_166 = arith.constant 1.48851585 : f32
    %634 = vector.broadcast %cst_166 : f32 to vector<8x128xf32>
    %635 = arith.addf %634, %633 : vector<8x128xf32>
    %636 = arith.mulf %628, %635 : vector<8x128xf32>
    %cst_167 = arith.constant -1.13520396 : f32
    %637 = vector.broadcast %cst_167 : f32 to vector<8x128xf32>
    %638 = arith.addf %637, %636 : vector<8x128xf32>
    %639 = arith.mulf %628, %638 : vector<8x128xf32>
    %cst_168 = arith.constant 0.278868079 : f32
    %640 = vector.broadcast %cst_168 : f32 to vector<8x128xf32>
    %641 = arith.addf %640, %639 : vector<8x128xf32>
    %642 = arith.mulf %628, %641 : vector<8x128xf32>
    %cst_169 = arith.constant -0.186288059 : f32
    %643 = vector.broadcast %cst_169 : f32 to vector<8x128xf32>
    %644 = arith.addf %643, %642 : vector<8x128xf32>
    %645 = arith.mulf %628, %644 : vector<8x128xf32>
    %cst_170 = arith.constant 0.0967841818 : f32
    %646 = vector.broadcast %cst_170 : f32 to vector<8x128xf32>
    %647 = arith.addf %646, %645 : vector<8x128xf32>
    %648 = arith.mulf %628, %647 : vector<8x128xf32>
    %cst_171 = arith.constant 0.374091953 : f32
    %649 = vector.broadcast %cst_171 : f32 to vector<8x128xf32>
    %650 = arith.addf %649, %648 : vector<8x128xf32>
    %651 = arith.mulf %628, %650 : vector<8x128xf32>
    %cst_172 = arith.constant 1.00002372 : f32
    %652 = vector.broadcast %cst_172 : f32 to vector<8x128xf32>
    %653 = arith.addf %652, %651 : vector<8x128xf32>
    %654 = arith.mulf %628, %653 : vector<8x128xf32>
    %cst_173 = arith.constant -1.26551223 : f32
    %655 = vector.broadcast %cst_173 : f32 to vector<8x128xf32>
    %656 = arith.addf %655, %654 : vector<8x128xf32>
    %cst_174 = arith.constant 0.000000e+00 : f32
    %657 = vector.broadcast %cst_174 : f32 to vector<8x128xf32>
    %658 = arith.subf %657, %623 : vector<8x128xf32>
    %659 = arith.mulf %658, %623 : vector<8x128xf32>
    %660 = arith.addf %659, %656 : vector<8x128xf32>
    %661 = math.exp %660 : vector<8x128xf32>
    %662 = arith.mulf %628, %661 : vector<8x128xf32>
    %cst_175 = arith.constant 0.000000e+00 : f32
    %663 = vector.broadcast %cst_175 : f32 to vector<8x128xf32>
    %664 = arith.cmpf oge, %622, %663 : vector<8x128xf32>
    %cst_176 = arith.constant 1.000000e+00 : f32
    %665 = vector.broadcast %cst_176 : f32 to vector<8x128xf32>
    %666 = arith.subf %665, %662 : vector<8x128xf32>
    %cst_177 = arith.constant 1.000000e+00 : f32
    %667 = vector.broadcast %cst_177 : f32 to vector<8x128xf32>
    %668 = arith.subf %662, %667 : vector<8x128xf32>
    %669 = arith.select %664, %666, %668 : vector<8x128xi1>, vector<8x128xf32>
    %cst_178 = arith.constant 1.000000e+00 : f32
    %670 = vector.broadcast %cst_178 : f32 to vector<8x128xf32>
    %671 = arith.addf %670, %669 : vector<8x128xf32>
    %672 = arith.mulf %620, %671 : vector<8x128xf32>
    %673 = arith.truncf %672 : vector<8x128xf32> to vector<8x128xbf16>
    %cst_179 = arith.constant dense<0.000000e+00> : vector<8x32xf32>
    %674 = tpu.matmul %673, %462, %cst_179 {dimension_numbers = #tpu.dot_dimension_numbers<[1], [0], [0], [1], [0, 0, 1, 1], [], []>} : vector<8x128xbf16>, vector<128x32xbf16>, vector<8x32xf32> -> vector<8x32xf32>
    %675 = vector.broadcast %470 : vector<1x32xf32> to vector<8x32xf32>
    %676 = arith.addf %674, %675 : vector<8x32xf32>
    %677 = arith.addf %590, %676 : vector<8x32xf32>
    %678 = vector.extract_strided_slice %677 {offsets = [1, 0], sizes = [1, 32], strides = [1, 1]} : vector<8x32xf32> to vector<1x32xf32>
    %679 = vector.extract_strided_slice %677 {offsets = [2, 0], sizes = [1, 32], strides = [1, 1]} : vector<8x32xf32> to vector<1x32xf32>
    %680 = vector.extract_strided_slice %677 {offsets = [3, 0], sizes = [1, 32], strides = [1, 1]} : vector<8x32xf32> to vector<1x32xf32>
    %681 = vector.extract_strided_slice %677 {offsets = [4, 0], sizes = [1, 32], strides = [1, 1]} : vector<8x32xf32> to vector<1x32xf32>
    %682 = tpu.concatenate %678, %679, %680, %681 in 1 : vector<1x32xf32>, vector<1x32xf32>, vector<1x32xf32>, vector<1x32xf32> -> vector<1x128xf32>
    %c0_180 = arith.constant 0 : index
    %c0_181 = arith.constant 0 : index
    %c0_182 = arith.constant 0 : index
    %683 = vector.load %arg7[%c0_180, %c0_181, %c0_182] : memref<1x1x128xf32, #tpu.memory_space<vmem>>, vector<1x1x128xf32>
    %684 = vector.shape_cast %683 : vector<1x1x128xf32> to vector<1x128xf32>
    %685 = vector.shape_cast %682 : vector<1x128xf32> to vector<1x1x128xf32>
    tpu.vector_store %arg7[%c0_180, %c0_181, %c0_182], %685 {strides = array<i32>} : memref<1x1x128xf32, #tpu.memory_space<vmem>>, vector<1x1x128xf32>,
    return
  }
  func.func @transform_0(%arg0: i32) -> (i32, i32, i32) {
    %c0_i32 = arith.constant 0 : i32
    %c0_i32_0 = arith.constant 0 : i32
    %c0_i32_1 = arith.constant 0 : i32
    return %arg0, %c0_i32, %c0_i32_0 : i32, i32, i32
  }
  func.func @transform_1(%arg0: i32) -> (i32, i32) {
    %c0_i32 = arith.constant 0 : i32
    %c0_i32_0 = arith.constant 0 : i32
    %c0_i32_1 = arith.constant 0 : i32
    return %c0_i32, %c0_i32_0 : i32, i32
  }
  func.func @transform_2(%arg0: i32) -> (i32, i32) {
    %c0_i32 = arith.constant 0 : i32
    %c0_i32_0 = arith.constant 0 : i32
    %c0_i32_1 = arith.constant 0 : i32
    return %c0_i32, %c0_i32_0 : i32, i32
  }
  func.func @transform_3(%arg0: i32) -> (i32, i32, i32) {
    %c0_i32 = arith.constant 0 : i32
    %c0_i32_0 = arith.constant 0 : i32
    %c0_i32_1 = arith.constant 0 : i32
    %c0_i32_2 = arith.constant 0 : i32
    return %c0_i32, %c0_i32_0, %c0_i32_1 : i32, i32, i32
  }
  func.func @transform_4(%arg0: i32) -> (i32, i32, i32) {
    %c0_i32 = arith.constant 0 : i32
    %c0_i32_0 = arith.constant 0 : i32
    %c0_i32_1 = arith.constant 0 : i32
    %c0_i32_2 = arith.constant 0 : i32
    return %c0_i32, %c0_i32_0, %c0_i32_1 : i32, i32, i32
  }
  func.func @transform_5(%arg0: i32) -> (i32, i32, i32) {
    %c0_i32 = arith.constant 0 : i32
    %c0_i32_0 = arith.constant 0 : i32
    %c0_i32_1 = arith.constant 0 : i32
    %c0_i32_2 = arith.constant 0 : i32
    return %c0_i32, %c0_i32_0, %c0_i32_1 : i32, i32, i32
  }
  func.func @transform_6(%arg0: i32) -> (i32, i32, i32) {
    %c0_i32 = arith.constant 0 : i32
    %c0_i32_0 = arith.constant 0 : i32
    %c0_i32_1 = arith.constant 0 : i32
    return %arg0, %c0_i32, %c0_i32_0 : i32, i32, i32
  }
}

</mosaic_0001>

<bundles_post_ra>
// kernel: vit_forward.1
= control target key start
LH: loop header
LB: loop body
LE: loop exit
PB: predicated region body
PF: predicated region fallthrough
CT: control target
= control target key end

     0   :  { %s2437_s21 = smov 0   ;;  %s2969_s0 = inlined_call_operand.vmem [shape: bf16[2,8,192], index: 0, kind: input, shape index: {}]   ;;  %s2970_s1 = inlined_call_operand.vmem [shape: bf16[192,32], index: 1, kind: input, shape index: {}]   ;;  %s2971_s2 = inlined_call_operand.vmem [shape: f32[8,32], index: 2, kind: input, shape index: {}]   ;;  %s2972_s3 = inlined_call_operand.vmem [shape: bf16[3,32,256], index: 3, kind: input, shape index: {}]   ;;  %s2973_s4 = inlined_call_operand.vmem [shape: bf16[3,128,32], index: 4, kind: input, shape index: {}]   ;;  %s2974_s5 = inlined_call_operand.vmem [shape: f32[3,8,128], index: 5, kind: input, shape index: {}]   ;;  %s2975_s6 = inlined_call_operand.vmem [shape: f32[2,1,128], index: 6, kind: output, shape index: {}]  }
   0x1 LB: > { %s1949_s22 = sadd.s32 4294967295, %s2383_s21   ;;  %p1953_p0 = scmp.ge.s32.totalorder %s2383_s21, 1  ;;  %s2383_s21 = sphi %s2437_s21, %s16_s21  }
   0x2   : > { %p212_p1 = scmp.lt.s32.totalorder %s2383_s21, 3 }
   0x4   : > { %p213_p2 = pnand %p1953_p0, %p212_p1 }
   0x5   : > { %p240_p3 = scmp.lt.s32.totalorder (!%p213_p2), %s1949_s22, 1  ;;  %s2386_s17 = smov (!%p213_p2), 88  }
   0x6   : > { %216 = sbr.rel (%p213_p2) target bundleno = 7216 (0x1c30), region = 44  ;;  %s2387_s18 = smov (!%p213_p2), 64  }
   0x7   : > { %s2388_s19 = smov (!%p213_p2), 96   ;;  %s2389_s20 = smov (!%p213_p2), 80  }
   0x8   : > { %s2390_s23 = smov (!%p213_p2), 120   ;;  %s2391_s24 = smov (!%p213_p2), 72  }
   0x9   : > { %s2392_s25 = smov (!%p213_p2), 112   ;;  %s2394_s26 = smov (!%p213_p2), 104  }
   0xa   : > { %s2395_s27 = smov (!%p213_p2), 56   ;;  %s2396_s28 = smov (!%p213_p2), 48  }
   0xb   : > { %v2237_v0 = vld [vmem:[%s2970_s1 + $0x38] sm:$0xff]  ;;  %v2236_v2 = vld [vmem:[%s2970_s1 + $0x30] sm:$0xff]  ;;  %s2982_s22 = smov (!%p240_p3, %s1949_s22), 1  ;;  %v2235_v4 = vld [vmem:[%s2970_s1 + $0x28] sm:$0xff]  ;;  %vm353_vm0 = vcmask 523264   ;;  %vm408_vm1 = vcmask 261120  }
   0xc   : > { %v2241_v1 = vld [vmem:[%s2970_s1 + $0x58] sm:$0xff]  ;;  %357 = vmatpush.bf16.msra.mxu0 %v2237_v0  ;;  %v2240_v3 = vld [vmem:[%s2970_s1 + $0x50] sm:$0xff]  ;;  %s2229_s7 = sshll.u32 %s2982_s22, 3  ;;  %v2239_v5 = vld [vmem:[%s2970_s1 + $0x48] sm:$0xff]  ;;  %v2385_v25 = vmov 32.0   ;;  %vm513_vm6 = vcmask 1043456  }
   0xd   : > { %374 = vmatpush.bf16.msra.mxu1 %v2241_v1  ;;  %s244_s10 = scalar_lea.vmem %s2969_s0, %s2229_s7  ;;  %v2234_v7 = vld [vmem:[%s2970_s1 + $0x20] sm:$0xff]  ;;  %v2233_v10 = vld [vmem:[%s2970_s1 + $0x18] sm:$0xff]  ;;  %v2232_v12 = vld [vmem:[%s2970_s1 + $0x10] sm:$0xff]  ;;  %2303 = vrcp.f32 %v2385_v25  ;;  %vm476_vm7 = vcmask 64512   ;;  %s2397_s29 = smov 40   ;;  %vm711_vm9 = vcmask 130048  }
   0xe   : > { %v249_v6 = vld [vmem:[%s244_s10] sm:$0xff]  ;;  %v2231_v13 = vld [vmem:[%s2970_s1 + $0x8] sm:$0xff]  ;;  %v2011_v37 = vld [vmem:[%s2972_s3 + $0x10] sm:$0xf]  ;;  %s2398_s30 = smov 8   ;;  %s2399_s7 = smov 32  }
   0xf   : > { %v277_v8 = vunpack.c.h.b16 %v249_v6  ;;  %v2238_v9 = vld [vmem:[%s2970_s1 + $0x40] sm:$0xff]  ;;  %v276_v14 = vunpack.c.l.b16 %v249_v6  ;;  %v2245_v38 = vld [vmem:[%s2972_s3 + $0x14] sm:$0xf0]  ;;  %v2243_v41 = vld [vmem:[%s2972_s3 + $0x4] sm:$0xf0]  ;;  %s2976_s8 = smov 24  }
  0x10   : > { %358 = vmatpush.bf16.msra.mxu0 %v2236_v2  ;;  %v2230_v15 = vld [vmem:[%s2970_s1] sm:$0xff]  ;;  %v2506_v39 = vor.u32 %v2245_v38, %v2011_v37  ;;  %s2978_s9 = smov 16   ;;  %vm713_vm10 = vcmask 195584   ;;  %s2979_s11 = smov 24  }
  0x11   : > { %375 = vmatpush.bf16.msra.mxu1 %v2240_v3  ;;  %v279_v11 = vpack.c.b16 %v277_v8, %v277_v8  ;;  %v278_v16 = vpack.c.b16 %v276_v14, %v276_v14  ;;  %v274_v19 = vld [vmem:[%s2971_s2] sm:$0xff]  ;;  %v2393_v14 = vmov -1e+30  }
  0x12   : > { %v2007_v40 = vld [vmem:[%s2972_s3] sm:$0xf]  ;;  %465 = vmatpush.bf16.msra.mxu3 %v2506_v39 }
  0x13   : > { %v2304_v26 = vpop.eup %2303  ;;  %v2515_v42 = vor.u32 %v2243_v41, %v2007_v40  ;;  %v2522_v51 = vld [vmem:[%s2974_s5] sm:$0xff] }
  0x14   : > { %359 = vmatpush.bf16.msra.mxu0 %v2235_v4  ;;  %v413_v27 = vmul.f32 32.0, %v2304_v26  ;;  %vm417_vm2 = vweird.f32 %v2304_v26  ;;  %v438_v53 = vperm.slane %v2522_v51, 0  ;;  %v440_v56 = vperm.slane %v2522_v51, 1 }
  0x15   : > { %376 = vmatpush.bf16.msra.mxu1 %v2239_v5  ;;  %v443_v60 = vperm.slane %v2522_v51, 7 }
  0x16   : > { %v414_v28 = vsub.f32 1.0, %v413_v27  ;;  %466 = vmatpush.bf16.msra.mxu3 %v2515_v42 }
  0x18   : > { %360 = vmatpush.bf16.msra.mxu0 %v2234_v7  ;;  %v415_v29 = vmul.f32 %v2304_v26, %v414_v28 }
  0x19   : > { %377 = vmatpush.bf16.msra.mxu1 %v2238_v9 }
  0x1a   : > { %v416_v30 = vadd.f32 %v2304_v26, %v415_v29 }
  0x1c   : > { %361 = vmatpush.bf16.msra.mxu0 %v2233_v10  ;;  %2004 = vmatmul.msk.bf16.vlgmr.msra.gmra.mxu1 %vm353_vm0, %v279_v11  ;;  %v2495_v31 = vsel %vm417_vm2, %v2304_v26, %v416_v30 }
  0x20   : > { %362 = vmatpush.bf16.msra.mxu0 %v2232_v12  ;;  %v383_v12 = vlaneseq }
  0x24   : > { %363 = vmatpush.bf16.msra.mxu0 %v2231_v13  ;;  %v384_v13 = vand.u32 127, %v383_v12 }
  0x26   : > { %vm385_vm8 = vcmp.lt.s32.totalorder %v384_v13, 5 }
  0x28   : > { %364 = vmatpush.bf16.msra.mxu0 %v2230_v15  ;;  %v2552_v15 = vsel %vm385_vm8, 0.0, %v2393_v14 }
  0x2b   : > { %365 = vmatmul.bf16.vlgmr.msra.gmra.mxu0 %v278_v16 }
  0x99   : > { %v379_v17 = vpop.f32.mrf.mxu1 }
  0xa1   : > { %v381_v18 = vpop.f32.mrf.mxu1 }
  0xa8   : > { %v366_v20 = vpop.f32.mrf.mxu0 }
  0xa9   : > { %v367_v21 = vadd.f32 %v366_v20, %v274_v19 }
  0xab   : > { %v2491_v22 = vadd.f32 %v379_v17, %v367_v21 }
  0xad   : > { %v409_v23 = vsel %vm408_vm1, %v2491_v22, 0.0 }
  0xae   : > { %410 = vadd.xlane.f32.xlu0 %v409_v23 }
  0xb0   : > { %v368_v24 = vpop.f32.mrf.mxu0 }
 0x121   : > { %v411_v32 = vpop.xlane.xlu0 %410 }
 0x122   : > { %v419_v33 = vmul.f32 %v2495_v31, %v411_v32 }
 0x124   : > { %v420_v34 = vsub.f32 %v2491_v22, %v419_v33 }
 0x126   : > { %v421_v35 = vmul.f32 %v420_v34, %v420_v34 }
 0x128   : > { %v422_v36 = vsel %vm408_vm1, %v421_v35, 0.0 }
 0x129   : > { %423 = vadd.xlane.f32.xlu0 %v422_v36 }
 0x19c   : > { %v424_v43 = vpop.xlane.xlu0 %423 }
 0x19d   : > { %v425_v44 = vmul.f32 %v424_v43, %v2495_v31 }
 0x19f   : > { %v426_v45 = vadd.f32 1e-06, %v425_v44 }
 0x1a1   : > { %2305 = vrsqrt.f32 %v426_v45  ;;  %vm433_vm4 = vweird.f32 %v426_v45 }
 0x1a7   : > { %v2306_v46 = vpop.eup %2305 }
 0x1a8   : > { %v428_v47 = vmul.f32 %v2306_v46, %v426_v45  ;;  %vm434_vm3 = vweird.f32 %v2306_v46 }
 0x1a9   : > { %vm435_vm5 = vmor %vm433_vm4, %vm434_vm3 }
 0x1aa   : > { %v429_v48 = vmul.f32 %v2306_v46, %v428_v47 }
 0x1ac   : > { %v430_v49 = vmul.f32 0.5, %v429_v48 }
 0x1ae   : > { %v431_v50 = vsub.f32 1.5, %v430_v49 }
 0x1b0   : > { %v432_v52 = vmul.f32 %v2306_v46, %v431_v50 }
 0x1b2   : > { %v436_v54 = vsel %vm435_vm5, %v2306_v46, %v432_v52 }
 0x1b3   : > { %v437_v55 = vmul.f32 %v436_v54, %v420_v34 }
 0x1b5   : > { %v439_v57 = vmul.f32 %v438_v53, %v437_v55 }
 0x1b7   : > { %v441_v58 = vadd.f32 %v440_v56, %v439_v57 }
 0x1b9   : > { %v442_v59 = vpack.c.bf16 %v441_v58, %v441_v58 }
 0x1bb   : > { %2013 = vmatmul.msk.bf16.vlgmr.msra.gmra.mxu3 %vm408_vm1, %v442_v59 }
 0x23e   : > { %v468_v61 = vpop.f32.mrf.mxu3 }
 0x23f   : > { %v469_v62 = vadd.f32 %v468_v61, %v443_v60 }
 0x241   : > { %v2528_v63 = vpack.c.bf16 %v469_v62, %v469_v62 }
 0x243   : > { %532 = vrot.lane.b32.xlu0 %v2528_v63, %s2386_s17  ;;  %508 = vrot.lane.b32.xlu2 %v2528_v63, %s2387_s18 }
 0x244   : > { %474 = vrot.lane.b32.xlu1 %v2528_v63, %s2388_s19 }
 0x246   : > { %v470_v0 = vpop.f32.mrf.mxu3 }
 0x24b   : > { %588 = vrot.lane.b32.xlu0 %v2528_v63, %s2389_s20  ;;  %530 = vrot.lane.b32.xlu2 %v2528_v63, %s2390_s23 }
 0x253   : > { %644 = vrot.lane.b32.xlu0 %v2528_v63, %s2391_s24  ;;  %586 = vrot.lane.b32.xlu2 %v2528_v63, %s2392_s25 }
 0x29d   : > { %v509_v1 = vpop.permute.xlu2 %508 }
 0x29e   : > { %v515_v2 = vsel %vm513_vm6, %v509_v1, 0 }
 0x29f   : > { %524 = vmatpush.bf16.msra.mxu2 %v515_v2 }
 0x2a5   : > { %v531_v11 = vpop.permute.xlu2 %530 }
 0x2ad   : > { %v587_v36 = vpop.permute.xlu2 %586 }
 0x2b5   : > { %v533_v3 = vpop.permute.xlu0 %532 }
 0x2b6   : > { %v538_v4 = vsel %vm476_vm7, %v533_v3, 0  ;;  %v475_v5 = vpop.permute.xlu1 %474 }
 0x2b7   : > { %v481_v6 = vsel %vm476_vm7, %v475_v5, 0 }
 0x2b8   : > { %490 = vmatpush.bf16.xpose.msrb.mxu3 %v481_v6 }
 0x2bd   : > { %v589_v7 = vpop.permute.xlu0 %588 }
 0x2be   : > { %v594_v8 = vsel %vm476_vm7, %v589_v7, 0 }
 0x2bf   : > { %2014 = vmatmul.msk.bf16.vlgmr.msrb.gmra.mxu3 %vm476_vm7, %v2528_v63  ;;  %603 = vmatpush.bf16.xpose.msrb.mxu2 %v594_v8 }
 0x2c0   : > { %547 = vmatpush.bf16.xpose.msra.mxu3 %v538_v4 }
 0x2c5   : > { %v645_v9 = vpop.permute.xlu0 %644 }
 0x2c6   : > { %v650_v10 = vsel %vm476_vm7, %v645_v9, 0 }
 0x2c7   : > { %659 = vmatpush.bf16.xpose.msrb.mxu0 %v650_v10 }
 0x2cf   : > { %2016 = vmatmul.msk.bf16.vlgmr.msra.gmra.mxu3 %vm476_vm7, %v531_v11 }
 0x342   : > { %v492_v16 = vpop.f32.mrf.mxu3 }
 0x343   : > { %v493_v17 = vadd.f32 %v492_v16, %v2552_v15 }
 0x345   : > { %v496_v18 = vsel %vm476_vm7, %v493_v17, -inf }
 0x346   : > { %497 = vmax.xlane.f32.xlu1 %v496_v18 }
 0x34a   : > { %v494_v19 = vpop.f32.mrf.mxu3 }
 0x352   : > { %v549_v20 = vpop.f32.mrf.mxu3 }
 0x353   : > { %v550_v21 = vadd.f32 %v549_v20, %v2552_v15 }
 0x355   : > { %v553_v23 = vsel %vm476_vm7, %v550_v21, -inf }
 0x356   : > { %554 = vmax.xlane.f32.xlu1 %v553_v23 }
 0x35a   : > { %v551_v24 = vpop.f32.mrf.mxu3 }
 0x3b9   : > { %v498_v25 = vpop.xlane.xlu1 %497 }
 0x3ba   : > { %v499_v26 = vsub.f32 %v493_v17, %v498_v25 }
 0x3bc   : > { %v500_v27 = vmul.f32 1.442695, %v499_v26 }
 0x3be   : > { %2307 = vpow2.f32 %v500_v27 }
 0x3c4   : > { %v2308_v28 = vpop.eup %2307 }
 0x3c5   : > { %v502_v29 = vsel %vm476_vm7, %v2308_v28, 0.0 }
 0x3c6   : > { %503 = vadd.xlane.f32.xlu2 %v502_v29 }
 0x3c9   : > { %v555_v30 = vpop.xlane.xlu1 %554 }
 0x3ca   : > { %v556_v32 = vsub.f32 %v550_v21, %v555_v30 }
 0x3cc   : > { %v557_v33 = vmul.f32 1.442695, %v556_v32 }
 0x3ce   : > { %2309 = vpow2.f32 %v557_v33 }
 0x3d4   : > { %v2310_v34 = vpop.eup %2309 }
 0x3d5   : > { %v559_v35 = vsel %vm476_vm7, %v2310_v34, 0.0 }
 0x3d6   : > { %560 = vadd.xlane.f32.xlu1 %v559_v35  ;;  %v716_v35 = vperm.slane %v2522_v51, 4 }
 0x3de   : > { %642 = vrot.lane.b32.xlu2 %v2528_v63, %s2394_s26 }
 0x3ef   : > { %565 = vrot.lane.b32.xlu1 %v2528_v63, %s2395_s27 }
 0x439   : > { %v504_v37 = vpop.xlane.xlu2 %503 }
 0x43a   : > { %2311 = vrcp.f32 %v504_v37 }
 0x440   : > { %v2312_v38 = vpop.eup %2311 }
 0x441   : > { %v643_v40 = vpop.permute.xlu2 %642  ;;  %v506_v41 = vmul.f32 %v2312_v38, %v2308_v28 }
 0x442   : > { %2020 = vmatmul.msk.bf16.vlgmr.msrb.gmra.mxu0 %vm476_vm7, %v643_v40 }
 0x443   : > { %v507_v43 = vpack.c.bf16 %v506_v41, %v506_v41 }
 0x445   : > { %2015 = vmatmul.msk.bf16.vlgmr.msra.gmra.mxu2 %vm476_vm7, %v507_v43 }
 0x449   : > { %v561_v44 = vpop.xlane.xlu1 %560 }
 0x44a   : > { %2313 = vrcp.f32 %v561_v44 }
 0x450   : > { %v2314_v45 = vpop.eup %2313 }
 0x451   : > { %v563_v46 = vmul.f32 %v2314_v45, %v2310_v34 }
 0x453   : > { %v564_v49 = vpack.c.bf16 %v563_v46, %v563_v46 }
 0x455   : > { %2018 = vmatmul.msk.bf16.vlgmr.msrb.gmra.mxu2 %vm476_vm7, %v587_v36 }
 0x461   : > { %v566_v47 = vpop.permute.xlu1 %565 }
 0x462   : > { %v571_v48 = vsel %vm513_vm6, %v566_v47, 0 }
 0x463   : > { %580 = vmatpush.bf16.msrb.mxu1 %v571_v48  ;;  %v2244_v48 = vld [vmem:[%s2972_s3 + $0x14] sm:$0xf] }
 0x466   : > { %2017 = vmatmul.msk.bf16.vlgmr.msrb.gmra.mxu1 %vm476_vm7, %v564_v49 }
 0x4bf   : > { %v661_v50 = vpop.f32.mrf.mxu0 }
 0x4c0   : > { %v662_v52 = vadd.f32 %v661_v50, %v2552_v15  ;;  %v2242_v50 = vld [vmem:[%s2972_s3 + $0x4] sm:$0xf] }
 0x4c2   : > { %v665_v53 = vsel %vm476_vm7, %v662_v52, -inf }
 0x4c3   : > { %666 = vmax.xlane.f32.xlu2 %v665_v53 }
 0x4c7   : > { %v663_v54 = vpop.f32.mrf.mxu0 }
 0x4c8   : > { %v2571_v55 = vpop.f32.mrf.mxu2 }
 0x4d0   : > { %v528_v56 = vpop.f32.mrf.mxu2 }
 0x4d8   : > { %v605_v57 = vpop.f32.mrf.mxu2 }
 0x4d9   : > { %v606_v58 = vadd.f32 %v605_v57, %v2552_v15 }
 0x4db   : > { %621 = vrot.lane.b32.xlu2 %v2528_v63, %s2396_s28  ;;  %v609_v59 = vsel %vm476_vm7, %v606_v58, -inf }
 0x4dc   : > { %610 = vmax.xlane.f32.xlu0 %v609_v59 }
 0x4e0   : > { %v607_v60 = vpop.f32.mrf.mxu2 }
 0x4e3   : > { %v582_v61 = vpop.f32.mrf.mxu1  ;;  %719 = vrot.lane.b32.xlu2 %v2506_v39, %s2399_s7 }
 0x4eb   : > { %v584_v62 = vpop.f32.mrf.mxu1 }
 0x536   : > { %v667_v0 = vpop.xlane.xlu2 %666 }
 0x537   : > { %v668_v1 = vsub.f32 %v662_v52, %v667_v0  ;;  %v2023_v52 = vld [vmem:[%s2972_s3 + $0x8] sm:$0xf0]  ;;  %v762_v0 = vperm.slane %v2522_v51, 2 }
 0x538   : > { %v2026_v53 = vor.u32 %v2242_v50, %v2023_v52 }
 0x539   : > { %v669_v2 = vmul.f32 1.442695, %v668_v1 }
 0x53b   : > { %2315 = vpow2.f32 %v669_v2 }
 0x53e   : > { %v622_v3 = vpop.permute.xlu2 %621 }
 0x53f   : > { %v627_v4 = vsel %vm513_vm6, %v622_v3, 0  ;;  %v764_v3 = vperm.slane %v2522_v51, 3 }
 0x540   : > { %636 = vmatpush.bf16.msrb.mxu3 %v627_v4 }
 0x541   : > { %v2316_v5 = vpop.eup %2315 }
 0x542   : > { %v671_v6 = vsel %vm476_vm7, %v2316_v5, 0.0 }
 0x543   : > { %672 = vadd.xlane.f32.xlu0 %v671_v6 }
 0x546   : > { %v720_v23 = vpop.permute.xlu2 %719 }
 0x547   : > { %732 = vmatpush.bf16.msra.mxu2 %v720_v23  ;;  %v2250_v23 = vld [vmem:[%s2973_s4 + $0x20] sm:$0xff] }
 0x54f   : > { %v611_v7 = vpop.xlane.xlu0 %610 }
 0x550   : > { %v612_v8 = vsub.f32 %v606_v58, %v611_v7  ;;  %v767_v7 = vperm.slane %v2522_v51, 6 }
 0x552   : > { %v613_v9 = vmul.f32 1.442695, %v612_v8 }
 0x554   : > { %2317 = vpow2.f32 %v613_v9 }
 0x557   : > { %677 = vrot.lane.b32.xlu0 %v2528_v63, %s2397_s29 }
 0x55a   : > { %v2318_v10 = vpop.eup %2317 }
 0x55b   : > { %v615_v11 = vsel %vm476_vm7, %v2318_v10, 0.0 }
 0x55c   : > { %616 = vadd.xlane.f32.xlu1 %v615_v11 }
 0x55f   : > { %699 = vrot.lane.b32.xlu0 %v582_v61, %s2398_s30 }
 0x575   : > { %717 = vrot.lane.b32.xlu1 %v2515_v42, %s2399_s7 }
 0x5b6   : > { %v673_v12 = vpop.xlane.xlu0 %672 }
 0x5b7   : > { %2319 = vrcp.f32 %v673_v12 }
 0x5bd   : > { %v2320_v13 = vpop.eup %2319 }
 0x5be   : > { %v675_v14 = vmul.f32 %v2320_v13, %v2316_v5 }
 0x5c0   : > { %v676_v18 = vpack.c.bf16 %v675_v14, %v675_v14 }
 0x5c9   : > { %v678_v16 = vpop.permute.xlu0 %677 }
 0x5ca   : > { %v683_v17 = vsel %vm513_vm6, %v678_v16, 0  ;;  %v2253_v16 = vld [vmem:[%s2973_s4 + $0x38] sm:$0xff] }
 0x5cb   : > { %692 = vmatpush.bf16.msra.mxu1 %v683_v17  ;;  %878 = vmatpush.bf16.msra.mxu0 %v2253_v16  ;;  %v2252_v17 = vld [vmem:[%s2973_s4 + $0x30] sm:$0xff] }
 0x5ce   : > { %2021 = vmatmul.msk.bf16.vlgmr.msra.gmra.mxu1 %vm476_vm7, %v676_v18 }
 0x5cf   : > { %v617_v63 = vpop.xlane.xlu1 %616  ;;  %879 = vmatpush.bf16.msra.mxu0 %v2252_v17 }
 0x5d0   : > { %2321 = vrcp.f32 %v617_v63 }
 0x5d1   : > { %v700_v27 = vpop.permute.xlu0 %699 }
 0x5d2   : > { %v710_v29 = vsel %vm476_vm7, %v2571_v55, %v700_v27  ;;  %v2248_v27 = vld [vmem:[%s2973_s4 + $0x10] sm:$0xff] }
 0x5d6   : > { %v2322_v19 = vpop.eup %2321 }
 0x5d7   : > { %v619_v20 = vmul.f32 %v2322_v19, %v2318_v10  ;;  %v2251_v19 = vld [vmem:[%s2973_s4 + $0x28] sm:$0xff] }
 0x5d8   : > { %880 = vmatpush.bf16.msra.mxu0 %v2251_v19 }
 0x5d9   : > { %v620_v21 = vpack.c.bf16 %v619_v20, %v619_v20 }
 0x5db   : > { %2019 = vmatmul.msk.bf16.vlgmr.msrb.gmra.mxu3 %vm476_vm7, %v620_v21 }
 0x5dc   : > { %881 = vmatpush.bf16.msra.mxu0 %v2250_v23 }
 0x5e7   : > { %v718_v26 = vpop.permute.xlu1 %717 }
 0x5e8   : > { %733 = vmatpush.bf16.msra.mxu2 %v718_v26 }
 0x64b   : > { %v694_v24 = vpop.f32.mrf.mxu1 }
 0x64c   : > { %707 = vrot.lane.b32.xlu0 %v694_v24, %s2976_s8 }
 0x653   : > { %v696_v25 = vpop.f32.mrf.mxu1 }
 0x65e   : > { %v638_v42 = vpop.f32.mrf.mxu3 }
 0x65f   : > { %703 = vrot.lane.b32.xlu2 %v638_v42, %s2978_s9  ;;  %v2249_v42 = vld [vmem:[%s2973_s4 + $0x18] sm:$0xff] }
 0x660   : > { %882 = vmatpush.bf16.msra.mxu0 %v2249_v42 }
 0x664   : > { %883 = vmatpush.bf16.msra.mxu0 %v2248_v27 }
 0x666   : > { %v640_v39 = vpop.f32.mrf.mxu3 }
 0x6b9   : > { %v704_v28 = vpop.permute.xlu2 %703 }
 0x6ba   : > { %v712_v30 = vsel %vm711_vm9, %v710_v29, %v704_v28 }
 0x6be   : > { %v708_v32 = vpop.permute.xlu0 %707 }
 0x6bf   : > { %v714_v33 = vsel %vm713_vm10, %v712_v30, %v708_v32  ;;  %v2247_v30 = vld [vmem:[%s2973_s4 + $0x8] sm:$0xff] }
 0x6c0   : > { %v715_v34 = vpack.c.bf16 %v714_v33, %v714_v33  ;;  %884 = vmatpush.bf16.msra.mxu0 %v2247_v30 }
 0x6c2   : > { %2022 = vmatmul.msk.bf16.vlgmr.msra.gmra.mxu2 %vm408_vm1, %v715_v34  ;;  %v2246_v34 = vld [vmem:[%s2973_s4] sm:$0xff] }
 0x6c4   : > { %885 = vmatpush.bf16.msra.mxu0 %v2246_v34 }
 0x745   : > { %v735_v36 = vpop.f32.mrf.mxu2 }
 0x746   : > { %v736_v37 = vadd.f32 %v735_v36, %v716_v35 }
 0x748   : > { %v2599_v38 = vadd.f32 %v736_v37, %v2491_v22  ;;  %v2027_v22 = vld [vmem:[%s2972_s3 + $0x18] sm:$0xf0] }
 0x749   : > { %v2030_v49 = vor.u32 %v2244_v48, %v2027_v22 }
 0x74a   : > { %v740_v40 = vsel %vm408_vm1, %v2599_v38, 0.0 }
 0x74b   : > { %741 = vadd.xlane.f32.xlu2 %v740_v40  ;;  %785 = vmatpush.bf16.msra.mxu3 %v2030_v49 }
 0x74d   : > { %v737_v41 = vpop.f32.mrf.mxu2 }
 0x74f   : > { %786 = vmatpush.bf16.msra.mxu3 %v2026_v53 }
 0x7be   : > { %v742_v43 = vpop.xlane.xlu2 %741 }
 0x7bf   : > { %v743_v44 = vmul.f32 %v742_v43, %v2495_v31 }
 0x7c1   : > { %v744_v45 = vsub.f32 %v2599_v38, %v743_v44 }
 0x7c3   : > { %v745_v46 = vmul.f32 %v744_v45, %v744_v45 }
 0x7c5   : > { %v746_v47 = vsel %vm408_vm1, %v745_v46, 0.0 }
 0x7c6   : > { %747 = vadd.xlane.f32.xlu0 %v746_v47 }
 0x839   : > { %v748_v54 = vpop.xlane.xlu0 %747 }
 0x83a   : > { %v749_v55 = vmul.f32 %v748_v54, %v2495_v31 }
 0x83c   : > { %v750_v56 = vadd.f32 1e-06, %v749_v55 }
 0x83e   : > { %2323 = vrsqrt.f32 %v750_v56  ;;  %vm757_vm12 = vweird.f32 %v750_v56 }
 0x844   : > { %v2324_v57 = vpop.eup %2323 }
 0x845   : > { %v752_v58 = vmul.f32 %v2324_v57, %v750_v56  ;;  %vm758_vm11 = vweird.f32 %v2324_v57 }
 0x846   : > { %vm759_vm13 = vmor %vm757_vm12, %vm758_vm11 }
 0x847   : > { %v753_v59 = vmul.f32 %v2324_v57, %v752_v58  ;;  %v829_v58 = vperm.slane %v2522_v51, 5  ;;  %v2092_v51 = vld [vmem:[%s2972_s3 + $0x30] sm:$0xf] }
 0x849   : > { %v754_v60 = vmul.f32 0.5, %v753_v59 }
 0x84b   : > { %v755_v61 = vsub.f32 1.5, %v754_v60 }
 0x84d   : > { %v756_v62 = vmul.f32 %v2324_v57, %v755_v61 }
 0x84f   : > { %v760_v1 = vsel %vm759_vm13, %v2324_v57, %v756_v62 }
 0x850   : > { %v761_v2 = vmul.f32 %v760_v1, %v744_v45 }
 0x852   : > { %v763_v4 = vmul.f32 %v762_v0, %v761_v2 }
 0x854   : > { %v765_v5 = vadd.f32 %v764_v3, %v763_v4 }
 0x856   : > { %v766_v6 = vpack.c.bf16 %v765_v5, %v765_v5 }
 0x858   : > { %2031 = vmatmul.msk.bf16.vlgmr.msra.gmra.mxu3 %vm408_vm1, %v766_v6 }
 0x8db   : > { %v788_v8 = vpop.f32.mrf.mxu3 }
 0x8dc   : > { %v789_v9 = vadd.f32 %v788_v8, %v767_v7  ;;  %v2088_v7 = vld [vmem:[%s2972_s3 + $0x20] sm:$0xf]  ;;  %v2255_v8 = vld [vmem:[%s2972_s3 + $0x24] sm:$0xf0] }
 0x8de   : > { %v793_v10 = vmul.f32 0.70710677, %v789_v9  ;;  %v792_v54 = vmul.f32 0.5, %v789_v9  ;;  %v2671_v9 = vor.u32 %v2255_v8, %v2088_v7 }
 0x8e0   : > { %v794_v11 = vand.u32 2147483647, %v793_v10  ;;  %vm822_vm14 = vcmp.ge.f32.partialorder %v793_v10, 0.0 }
 0x8e2   : > { %v795_v12 = vmul.f32 0.5, %v794_v11  ;;  %v816_v43 = vsub.f32 0.0, %v794_v11 }
 0x8e3   : > { %v790_v13 = vpop.f32.mrf.mxu3 }
 0x8e4   : > { %v796_v14 = vadd.f32 1.0, %v795_v12  ;;  %v817_v46 = vmul.f32 %v816_v43, %v794_v11 }
 0x8e6   : > { %2325 = vrcp.f32 %v796_v14 }
 0x8ec   : > { %v2326_v18 = vpop.eup %2325 }
 0x8ed   : > { %v798_v63 = vmul.f32 0.17087276, %v2326_v18 }
 0x8ef   : > { %v799_v20 = vadd.f32 -0.82215226, %v798_v63 }
 0x8f1   : > { %v800_v21 = vmul.f32 %v2326_v18, %v799_v20 }
 0x8f3   : > { %v801_v24 = vadd.f32 1.4885159, %v800_v21 }
 0x8f5   : > { %v802_v25 = vmul.f32 %v2326_v18, %v801_v24 }
 0x8f7   : > { %v803_v39 = vadd.f32 -1.135204, %v802_v25 }
 0x8f9   : > { %v804_v26 = vmul.f32 %v2326_v18, %v803_v39 }
 0x8fb   : > { %v805_v28 = vadd.f32 0.27886808, %v804_v26 }
 0x8fd   : > { %v806_v29 = vmul.f32 %v2326_v18, %v805_v28 }
 0x8ff   : > { %v807_v32 = vadd.f32 -0.18628806, %v806_v29 }
 0x901   : > { %v808_v33 = vmul.f32 %v2326_v18, %v807_v32 }
 0x903   : > { %v809_v35 = vadd.f32 0.09678418, %v808_v33 }
 0x905   : > { %v810_v36 = vmul.f32 %v2326_v18, %v809_v35 }
 0x907   : > { %v811_v37 = vadd.f32 0.37409195, %v810_v36 }
 0x909   : > { %v812_v40 = vmul.f32 %v2326_v18, %v811_v37 }
 0x90b   : > { %v813_v41 = vadd.f32 1.0000237, %v812_v40 }
 0x90d   : > { %v814_v44 = vmul.f32 %v2326_v18, %v813_v41 }
 0x90f   : > { %v815_v45 = vadd.f32 -1.2655122, %v814_v44 }
 0x911   : > { %v818_v47 = vadd.f32 %v817_v46, %v815_v45 }
 0x913   : > { %v819_v48 = vmul.f32 1.442695, %v818_v47 }
 0x915   : > { %2327 = vpow2.f32 %v819_v48 }
 0x91b   : > { %v2328_v22 = vpop.eup %2327 }
 0x91c   : > { %v821_v49 = vmul.f32 %v2328_v22, %v2326_v18  ;;  %v2678_v18 = vld [vmem:[%s2974_s5 + $0x8] sm:$0xff] }
 0x91d   : > { %v938_v20 = vperm.slane %v2678_v18, 0  ;;  %v940_v24 = vperm.slane %v2678_v18, 1  ;;  %v943_v26 = vperm.slane %v2678_v18, 7 }
 0x91e   : > { %v823_v50 = vsub.f32 1.0, %v821_v49  ;;  %v2032_v52 = vadd.f32 -1.0, %v821_v49 }
 0x920   : > { %v825_v53 = vsel %vm822_vm14, %v823_v50, %v2032_v52 }
 0x921   : > { %v826_v55 = vadd.f32 1.0, %v825_v53 }
 0x923   : > { %v827_v56 = vmul.f32 %v826_v55, %v792_v54 }
 0x925   : > { %v828_v57 = vpack.c.bf16 %v827_v56, %v827_v56 }
 0x927   : > { %886 = vmatmul.bf16.vlgmr.msra.gmra.mxu0 %v828_v57 }
 0x9a4   : > { %v887_v59 = vpop.f32.mrf.mxu0 }
 0x9a5   : > { %v888_v60 = vadd.f32 %v887_v59, %v829_v58 }
 0x9a7   : > { %v2649_v61 = vadd.f32 %v888_v60, %v2599_v38  ;;  %v2257_v38 = vld [vmem:[%s2972_s3 + $0x34] sm:$0xf0] }
 0x9a8   : > { %v2662_v6 = vor.u32 %v2257_v38, %v2092_v51 }
 0x9a9   : > { %v916_v62 = vsel %vm408_vm1, %v2649_v61, 0.0 }
 0x9aa   : > { %917 = vadd.xlane.f32.xlu1 %v916_v62  ;;  %965 = vmatpush.bf16.msrb.mxu1 %v2662_v6 }
 0x9ac   : > { %v889_v0 = vpop.f32.mrf.mxu0 }
 0x9ae   : > { %966 = vmatpush.bf16.msrb.mxu1 %v2671_v9 }
 0xa1d   : > { %v918_v1 = vpop.xlane.xlu1 %917 }
 0xa1e   : > { %v919_v2 = vmul.f32 %v918_v1, %v2495_v31 }
 0xa20   : > { %v920_v3 = vsub.f32 %v2649_v61, %v919_v2 }
 0xa22   : > { %v921_v4 = vmul.f32 %v920_v3, %v920_v3 }
 0xa24   : > { %v922_v5 = vsel %vm408_vm1, %v921_v4, 0.0 }
 0xa25   : > { %923 = vadd.xlane.f32.xlu2 %v922_v5 }
 0xa98   : > { %v924_v10 = vpop.xlane.xlu2 %923 }
 0xa99   : > { %v925_v11 = vmul.f32 %v924_v10, %v2495_v31 }
 0xa9b   : > { %v926_v12 = vadd.f32 1e-06, %v925_v11 }
 0xa9d   : > { %2329 = vrsqrt.f32 %v926_v12  ;;  %vm933_vm2 = vweird.f32 %v926_v12 }
 0xaa3   : > { %v2330_v13 = vpop.eup %2329 }
 0xaa4   : > { %v928_v14 = vmul.f32 %v2330_v13, %v926_v12  ;;  %vm934_vm15 = vweird.f32 %v2330_v13 }
 0xaa5   : > { %vm935_vm3 = vmor %vm933_vm2, %vm934_vm15  ;;  %vm1899_vm15 = vcmask 785408  }
 0xaa6   : > { %v929_v16 = vmul.f32 %v2330_v13, %v928_v14 }
 0xaa8   : > { %v930_v17 = vmul.f32 0.5, %v929_v16 }
 0xaaa   : > { %v931_v63 = vsub.f32 1.5, %v930_v17 }
 0xaac   : > { %v932_v19 = vmul.f32 %v2330_v13, %v931_v63 }
 0xaae   : > { %v936_v21 = vsel %vm935_vm3, %v2330_v13, %v932_v19 }
 0xaaf   : > { %v937_v23 = vmul.f32 %v936_v21, %v920_v3 }
 0xab1   : > { %v939_v25 = vmul.f32 %v938_v20, %v937_v23 }
 0xab3   : > { %v941_v42 = vadd.f32 %v940_v24, %v939_v25 }
 0xab5   : > { %v942_v39 = vpack.c.bf16 %v941_v42, %v941_v42 }
 0xab7   : > { %2094 = vmatmul.msk.bf16.vlgmr.msrb.gmra.mxu1 %vm408_vm1, %v942_v39 }
 0xb34   : > { %v968_v27 = vpop.f32.mrf.mxu1 }
 0xb35   : > { %v969_v28 = vadd.f32 %v968_v27, %v943_v26 }
 0xb37   : > { %v2684_v29 = vpack.c.bf16 %v969_v28, %v969_v28 }
 0xb39   : > { %1007 = vrot.lane.b32.xlu1 %v2684_v29, %s2387_s18  ;;  %974 = vrot.lane.b32.xlu0 %v2684_v29, %s2388_s19 }
 0xb3c   : > { %v970_v30 = vpop.f32.mrf.mxu1 }
 0xb41   : > { %1140 = vrot.lane.b32.xlu1 %v2684_v29, %s2394_s26  ;;  %1030 = vrot.lane.b32.xlu0 %v2684_v29, %s2386_s17 }
 0xb49   : > { %1086 = vrot.lane.b32.xlu0 %v2684_v29, %s2389_s20 }
 0xb51   : > { %1142 = vrot.lane.b32.xlu0 %v2684_v29, %s2391_s24 }
 0xb59   : > { %1084 = vrot.lane.b32.xlu0 %v2684_v29, %s2392_s25 }
 0xbab   : > { %v1008_v32 = vpop.permute.xlu1 %1007  ;;  %v975_v33 = vpop.permute.xlu0 %974 }
 0xbac   : > { %v1013_v34 = vsel %vm513_vm6, %v1008_v32, 0  ;;  %v980_v35 = vsel %vm476_vm7, %v975_v33, 0 }
 0xbad   : > { %989 = vmatpush.bf16.xpose.msrb.mxu2 %v980_v35  ;;  %1022 = vmatpush.bf16.msrb.mxu3 %v1013_v34 }
 0xbb3   : > { %v1031_v36 = vpop.permute.xlu0 %1030  ;;  %v1141_v59 = vpop.permute.xlu1 %1140 }
 0xbb4   : > { %v1036_v37 = vsel %vm476_vm7, %v1031_v36, 0  ;;  %2095 = vmatmul.msk.bf16.vlgmr.msrb.gmra.mxu2 %vm476_vm7, %v2684_v29 }
 0xbb5   : > { %1045 = vmatpush.bf16.xpose.msra.mxu1 %v1036_v37 }
 0xbbb   : > { %v1087_v40 = vpop.permute.xlu0 %1086 }
 0xbbc   : > { %v1092_v41 = vsel %vm476_vm7, %v1087_v40, 0 }
 0xbbd   : > { %1101 = vmatpush.bf16.xpose.msra.mxu3 %v1092_v41 }
 0xbc3   : > { %v1143_v43 = vpop.permute.xlu0 %1142 }
 0xbc4   : > { %v1148_v44 = vsel %vm476_vm7, %v1143_v43, 0 }
 0xbc5   : > { %1157 = vmatpush.bf16.xpose.msrb.mxu1 %v1148_v44 }
 0xbcb   : > { %v1085_v60 = vpop.permute.xlu0 %1084 }
 0xc37   : > { %v991_v45 = vpop.f32.mrf.mxu2 }
 0xc38   : > { %v992_v46 = vadd.f32 %v991_v45, %v2552_v15 }
 0xc3a   : > { %v995_v47 = vsel %vm476_vm7, %v992_v46, -inf }
 0xc3b   : > { %996 = vmax.xlane.f32.xlu2 %v995_v47 }
 0xc3f   : > { %v993_v48 = vpop.f32.mrf.mxu2 }
 0xcae   : > { %v997_v22 = vpop.xlane.xlu2 %996 }
 0xcaf   : > { %v998_v49 = vsub.f32 %v992_v46, %v997_v22 }
 0xcb1   : > { %v999_v50 = vmul.f32 1.442695, %v998_v49 }
 0xcb3   : > { %2331 = vpow2.f32 %v999_v50 }
 0xcb9   : > { %v2332_v52 = vpop.eup %2331 }
 0xcba   : > { %v1001_v53 = vsel %vm476_vm7, %v2332_v52, 0.0 }
 0xcbb   : > { %1002 = vadd.xlane.f32.xlu2 %v1001_v53 }
 0xcd3   : > { %1028 = vrot.lane.b32.xlu2 %v2684_v29, %s2390_s23 }
 0xd2e   : > { %v1003_v54 = vpop.xlane.xlu2 %1002 }
 0xd2f   : > { %2333 = vrcp.f32 %v1003_v54 }
 0xd35   : > { %v2334_v55 = vpop.eup %2333 }
 0xd36   : > { %v1005_v56 = vmul.f32 %v2334_v55, %v2332_v52  ;;  %v1029_v57 = vpop.permute.xlu2 %1028 }
 0xd37   : > { %2097 = vmatmul.msk.bf16.vlgmr.msra.gmra.mxu1 %vm476_vm7, %v1029_v57 }
 0xd38   : > { %v1006_v58 = vpack.c.bf16 %v1005_v56, %v1005_v56 }
 0xd3a   : > { %2096 = vmatmul.msk.bf16.vlgmr.msrb.gmra.mxu3 %vm476_vm7, %v1006_v58 }
 0xd47   : > { %2101 = vmatmul.msk.bf16.vlgmr.msrb.gmra.mxu1 %vm476_vm7, %v1141_v59 }
 0xd4a   : > { %2099 = vmatmul.msk.bf16.vlgmr.msra.gmra.mxu3 %vm476_vm7, %v1085_v60 }
 0xdb4   : > { %v1047_v62 = vpop.f32.mrf.mxu1 }
 0xdb5   : > { %v1048_v0 = vadd.f32 %v1047_v62, %v2552_v15 }
 0xdb7   : > { %v1051_v1 = vsel %vm476_vm7, %v1048_v0, -inf }
 0xdb8   : > { %1052 = vmax.xlane.f32.xlu2 %v1051_v1  ;;  %v1212_v1 = vperm.slane %v2678_v18, 4 }
 0xdbc   : > { %v1049_v2 = vpop.f32.mrf.mxu1 }
 0xdbd   : > { %v2718_v3 = vpop.f32.mrf.mxu3 }
 0xdc4   : > { %v1159_v4 = vpop.f32.mrf.mxu1 }
 0xdc5   : > { %v1160_v5 = vadd.f32 %v1159_v4, %v2552_v15  ;;  %v1026_v51 = vpop.f32.mrf.mxu3 }
 0xdc7   : > { %v1163_v38 = vsel %vm476_vm7, %v1160_v5, -inf }
 0xdc8   : > { %1164 = vmax.xlane.f32.xlu0 %v1163_v38 }
 0xdcc   : > { %v1161_v7 = vpop.f32.mrf.mxu1 }
 0xdcd   : > { %v1103_v8 = vpop.f32.mrf.mxu3 }
 0xdce   : > { %v1104_v10 = vadd.f32 %v1103_v8, %v2552_v15 }
 0xdd0   : > { %v1107_v11 = vsel %vm476_vm7, %v1104_v10, -inf }
 0xdd1   : > { %1108 = vmax.xlane.f32.xlu1 %v1107_v11 }
 0xdd5   : > { %v1105_v12 = vpop.f32.mrf.mxu3 }
 0xdd6   : > { %v2256_v12 = vld [vmem:[%s2972_s3 + $0x34] sm:$0xf] }
 0xddc   : > { %1063 = vrot.lane.b32.xlu0 %v2684_v29, %s2395_s27 }
 0xde4   : > { %1215 = vrot.lane.b32.xlu0 %v2662_v6, %s2399_s7 }
 0xe2b   : > { %v1053_v13 = vpop.xlane.xlu2 %1052 }
 0xe2c   : > { %v1054_v14 = vsub.f32 %v1048_v0, %v1053_v13 }
 0xe2e   : > { %v1055_v16 = vmul.f32 1.442695, %v1054_v14  ;;  %v2254_v14 = vld [vmem:[%s2972_s3 + $0x24] sm:$0xf] }
 0xe30   : > { %2335 = vpow2.f32 %v1055_v16  ;;  %v2104_v16 = vld [vmem:[%s2972_s3 + $0x28] sm:$0xf0] }
 0xe36   : > { %v2336_v17 = vpop.eup %2335 }
 0xe37   : > { %v1057_v63 = vsel %vm476_vm7, %v2336_v17, 0.0 }
 0xe38   : > { %1058 = vadd.xlane.f32.xlu2 %v1057_v63 }
 0xe3b   : > { %v1165_v19 = vpop.xlane.xlu0 %1164 }
 0xe3c   : > { %v1166_v20 = vsub.f32 %v1160_v5, %v1165_v19 }
 0xe3e   : > { %v1167_v21 = vmul.f32 1.442695, %v1166_v20 }
 0xe40   : > { %2337 = vpow2.f32 %v1167_v21 }
 0xe44   : > { %v1109_v23 = vpop.xlane.xlu1 %1108 }
 0xe45   : > { %v1110_v24 = vsub.f32 %v1104_v10, %v1109_v23 }
 0xe46   : > { %v2338_v25 = vpop.eup %2337 }
 0xe47   : > { %v1111_v42 = vmul.f32 1.442695, %v1110_v24  ;;  %v1169_v39 = vsel %vm476_vm7, %v2338_v25, 0.0 }
 0xe48   : > { %1170 = vadd.xlane.f32.xlu1 %v1169_v39 }
 0xe49   : > { %2339 = vpow2.f32 %v1111_v42 }
 0xe4e   : > { %v1064_v6 = vpop.permute.xlu0 %1063 }
 0xe4f   : > { %v2340_v26 = vpop.eup %2339  ;;  %v1069_v27 = vsel %vm513_vm6, %v1064_v6, 0  ;;  %v1258_v6 = vperm.slane %v2678_v18, 2 }
 0xe50   : > { %1078 = vmatpush.bf16.msra.mxu2 %v1069_v27  ;;  %v1113_v28 = vsel %vm476_vm7, %v2340_v26, 0.0 }
 0xe51   : > { %1114 = vadd.xlane.f32.xlu2 %v1113_v28  ;;  %v1260_v28 = vperm.slane %v2678_v18, 3 }
 0xe56   : > { %v1216_v50 = vpop.permute.xlu0 %1215 }
 0xe57   : > { %1228 = vmatpush.bf16.msrb.mxu3 %v1216_v50  ;;  %v2262_v50 = vld [vmem:[%s2973_s4 + $0x60] sm:$0xff] }
 0xe61   : > { %1175 = vrot.lane.b32.xlu1 %v2684_v29, %s2397_s29 }
 0xe69   : > { %1119 = vrot.lane.b32.xlu2 %v2684_v29, %s2396_s28 }
 0xeab   : > { %v1059_v30 = vpop.xlane.xlu2 %1058 }
 0xeac   : > { %2341 = vrcp.f32 %v1059_v30 }
 0xeb2   : > { %v2342_v32 = vpop.eup %2341 }
 0xeb3   : > { %v1061_v33 = vmul.f32 %v2342_v32, %v2336_v17  ;;  %v2107_v17 = vor.u32 %v2254_v14, %v2104_v16 }
 0xeb5   : > { %v1062_v34 = vpack.c.bf16 %v1061_v33, %v1061_v33 }
 0xeb7   : > { %2098 = vmatmul.msk.bf16.vlgmr.msra.gmra.mxu2 %vm476_vm7, %v1062_v34  ;;  %v1263_v34 = vperm.slane %v2678_v18, 6 }
 0xebb   : > { %v1171_v36 = vpop.xlane.xlu1 %1170 }
 0xec4   : > { %v1115_v35 = vpop.xlane.xlu2 %1114 }
 0xec5   : > { %2343 = vrcp.f32 %v1115_v35 }
 0xec6   : > { %2345 = vrcp.f32 %v1171_v36 }
 0xecb   : > { %v2344_v37 = vpop.eup %2343 }
 0xecc   : > { %v1117_v40 = vmul.f32 %v2344_v37, %v2340_v26  ;;  %v1120_v41 = vpop.permute.xlu2 %1119  ;;  %v2346_v45 = vpop.eup %2345 }
 0xecd   : > { %v1125_v43 = vsel %vm513_vm6, %v1120_v41, 0  ;;  %v1173_v29 = vmul.f32 %v2346_v45, %v2338_v25  ;;  %v2265_v45 = vld [vmem:[%s2973_s4 + $0x78] sm:$0xff] }
 0xece   : > { %v1118_v44 = vpack.c.bf16 %v1117_v40, %v1117_v40  ;;  %1134 = vmatpush.bf16.msrb.mxu0 %v1125_v43  ;;  %1374 = vmatpush.bf16.msra.mxu1 %v2265_v45 }
 0xecf   : > { %v1174_v48 = vpack.c.bf16 %v1173_v29, %v1173_v29  ;;  %v2264_v29 = vld [vmem:[%s2973_s4 + $0x70] sm:$0xff] }
 0xed1   : > { %2100 = vmatmul.msk.bf16.vlgmr.msrb.gmra.mxu0 %vm476_vm7, %v1118_v44 }
 0xed2   : > { %1375 = vmatpush.bf16.msra.mxu1 %v2264_v29 }
 0xed3   : > { %v1176_v46 = vpop.permute.xlu1 %1175 }
 0xed4   : > { %v1181_v47 = vsel %vm513_vm6, %v1176_v46, 0 }
 0xed5   : > { %1190 = vmatpush.bf16.msrb.mxu2 %v1181_v47 }
 0xed8   : > { %2102 = vmatmul.msk.bf16.vlgmr.msrb.gmra.mxu2 %vm476_vm7, %v1174_v48  ;;  %v2263_v48 = vld [vmem:[%s2973_s4 + $0x68] sm:$0xff] }
 0xed9   : > { %1376 = vmatpush.bf16.msra.mxu1 %v2263_v48 }
 0xedd   : > { %1377 = vmatpush.bf16.msra.mxu1 %v2262_v50 }
 0xf3a   : > { %v1080_v22 = vpop.f32.mrf.mxu2 }
 0xf3b   : > { %1197 = vrot.lane.b32.xlu0 %v1080_v22, %s2398_s30 }
 0xf42   : > { %v1082_v49 = vpop.f32.mrf.mxu2 }
 0xf43   : > { %1213 = vrot.lane.b32.xlu0 %v2671_v9, %s2399_s7 }
 0xf4e   : > { %v1136_v52 = vpop.f32.mrf.mxu0 }
 0xf4f   : > { %1201 = vrot.lane.b32.xlu2 %v1136_v52, %s2978_s9 }
 0xf56   : > { %v1138_v53 = vpop.f32.mrf.mxu0 }
 0xf5b   : > { %v1192_v54 = vpop.f32.mrf.mxu2 }
 0xf5c   : > { %1205 = vrot.lane.b32.xlu1 %v1192_v54, %s2979_s11  ;;  %v2261_v54 = vld [vmem:[%s2973_s4 + $0x58] sm:$0xff] }
 0xf5d   : > { %1378 = vmatpush.bf16.msra.mxu1 %v2261_v54 }
 0xf63   : > { %v1194_v55 = vpop.f32.mrf.mxu2 }
 0xfa9   : > { %v1202_v59 = vpop.permute.xlu2 %1201 }
 0xfad   : > { %v1198_v56 = vpop.permute.xlu0 %1197 }
 0xfae   : > { %v1208_v58 = vsel %vm476_vm7, %v2718_v3, %v1198_v56 }
 0xfaf   : > { %v1209_v9 = vsel %vm711_vm9, %v1208_v58, %v1202_v59 }
 0xfb5   : > { %v1214_v57 = vpop.permute.xlu0 %1213 }
 0xfb6   : > { %1229 = vmatpush.bf16.msrb.mxu3 %v1214_v57  ;;  %v2260_v57 = vld [vmem:[%s2973_s4 + $0x50] sm:$0xff] }
 0xfb7   : > { %1379 = vmatpush.bf16.msra.mxu1 %v2260_v57 }
 0xfce   : > { %v1206_v60 = vpop.permute.xlu1 %1205 }
 0xfcf   : > { %v1210_v62 = vsel %vm713_vm10, %v1209_v9, %v1206_v60  ;;  %v2259_v60 = vld [vmem:[%s2973_s4 + $0x48] sm:$0xff] }
 0xfd0   : > { %v1211_v0 = vpack.c.bf16 %v1210_v62, %v1210_v62  ;;  %1380 = vmatpush.bf16.msra.mxu1 %v2259_v60 }
 0xfd2   : > { %2103 = vmatmul.msk.bf16.vlgmr.msrb.gmra.mxu3 %vm408_vm1, %v1211_v0  ;;  %v2258_v0 = vld [vmem:[%s2973_s4 + $0x40] sm:$0xff] }
 0xfd4   : > { %1381 = vmatpush.bf16.msra.mxu1 %v2258_v0 }
0x1055   : > { %v1231_v2 = vpop.f32.mrf.mxu3 }
0x1056   : > { %v1232_v4 = vadd.f32 %v1231_v2, %v1212_v1 }
0x1058   : > { %v2753_v5 = vadd.f32 %v1232_v4, %v2649_v61  ;;  %v2108_v61 = vld [vmem:[%s2972_s3 + $0x38] sm:$0xf0] }
0x1059   : > { %v2111_v13 = vor.u32 %v2256_v12, %v2108_v61 }
0x105a   : > { %v1236_v51 = vsel %vm408_vm1, %v2753_v5, 0.0 }
0x105b   : > { %1237 = vadd.xlane.f32.xlu2 %v1236_v51  ;;  %1281 = vmatpush.bf16.msra.mxu0 %v2111_v13 }
0x105d   : > { %v1233_v3 = vpop.f32.mrf.mxu3 }
0x105f   : > { %1282 = vmatpush.bf16.msra.mxu0 %v2107_v17 }
0x10ce   : > { %v1238_v38 = vpop.xlane.xlu2 %1237 }
0x10cf   : > { %v1239_v7 = vmul.f32 %v1238_v38, %v2495_v31 }
0x10d1   : > { %v1240_v8 = vsub.f32 %v2753_v5, %v1239_v7 }
0x10d3   : > { %v1241_v10 = vmul.f32 %v1240_v8, %v1240_v8 }
0x10d5   : > { %v1242_v11 = vsel %vm408_vm1, %v1241_v10, 0.0 }
0x10d6   : > { %1243 = vadd.xlane.f32.xlu1 %v1242_v11 }
0x1149   : > { %v1244_v63 = vpop.xlane.xlu1 %1243 }
0x114a   : > { %v1245_v19 = vmul.f32 %v1244_v63, %v2495_v31 }
0x114c   : > { %v1246_v20 = vadd.f32 1e-06, %v1245_v19 }
0x114e   : > { %2347 = vrsqrt.f32 %v1246_v20  ;;  %vm1253_vm5 = vweird.f32 %v1246_v20 }
0x1154   : > { %v2348_v21 = vpop.eup %2347 }
0x1155   : > { %v1248_v23 = vmul.f32 %v2348_v21, %v1246_v20  ;;  %vm1254_vm4 = vweird.f32 %v2348_v21 }
0x1156   : > { %vm1255_vm8 = vmor %vm1253_vm5, %vm1254_vm4 }
0x1157   : > { %v1249_v24 = vmul.f32 %v2348_v21, %v1248_v23  ;;  %v1325_v23 = vperm.slane %v2678_v18, 5  ;;  %v2173_v18 = vld [vmem:[%s2972_s3 + $0x50] sm:$0xf] }
0x1159   : > { %v1250_v25 = vmul.f32 0.5, %v1249_v24 }
0x115b   : > { %v1251_v42 = vsub.f32 1.5, %v1250_v25 }
0x115d   : > { %v1252_v39 = vmul.f32 %v2348_v21, %v1251_v42 }
0x115f   : > { %v1256_v26 = vsel %vm1255_vm8, %v2348_v21, %v1252_v39 }
0x1160   : > { %v1257_v27 = vmul.f32 %v1256_v26, %v1240_v8 }
0x1162   : > { %v1259_v30 = vmul.f32 %v1258_v6, %v1257_v27 }
0x1164   : > { %v1261_v32 = vadd.f32 %v1260_v28, %v1259_v30 }
0x1166   : > { %v1262_v33 = vpack.c.bf16 %v1261_v32, %v1261_v32 }
0x1168   : > { %2112 = vmatmul.msk.bf16.vlgmr.msra.gmra.mxu0 %vm408_vm1, %v1262_v33 }
0x11e5   : > { %v1284_v35 = vpop.f32.mrf.mxu0 }
0x11e6   : > { %v1285_v36 = vadd.f32 %v1284_v35, %v1263_v34  ;;  %v2169_v34 = vld [vmem:[%s2972_s3 + $0x40] sm:$0xf]  ;;  %v2267_v35 = vld [vmem:[%s2972_s3 + $0x44] sm:$0xf0] }
0x11e8   : > { %v1289_v37 = vmul.f32 0.70710677, %v1285_v36  ;;  %v1288_v63 = vmul.f32 0.5, %v1285_v36  ;;  %v2825_v36 = vor.u32 %v2267_v35, %v2169_v34 }
0x11ea   : > { %v1290_v40 = vand.u32 2147483647, %v1289_v37  ;;  %vm1318_vm11 = vcmp.ge.f32.partialorder %v1289_v37, 0.0 }
0x11ec   : > { %v1291_v41 = vmul.f32 0.5, %v1290_v40  ;;  %v1312_v38 = vsub.f32 0.0, %v1290_v40 }
0x11ed   : > { %v1286_v43 = vpop.f32.mrf.mxu0 }
0x11ee   : > { %v1292_v44 = vadd.f32 1.0, %v1291_v41  ;;  %v1313_v10 = vmul.f32 %v1312_v38, %v1290_v40 }
0x11f0   : > { %2349 = vrcp.f32 %v1292_v44 }
0x11f6   : > { %v2350_v46 = vpop.eup %2349 }
0x11f7   : > { %v1294_v47 = vmul.f32 0.17087276, %v2350_v46 }
0x11f9   : > { %v1295_v22 = vadd.f32 -0.82215226, %v1294_v47 }
0x11fb   : > { %v1296_v49 = vmul.f32 %v2350_v46, %v1295_v22 }
0x11fd   : > { %v1297_v52 = vadd.f32 1.4885159, %v1296_v49 }
0x11ff   : > { %v1298_v53 = vmul.f32 %v2350_v46, %v1297_v52 }
0x1201   : > { %v1299_v55 = vadd.f32 -1.135204, %v1298_v53 }
0x1203   : > { %v1300_v56 = vmul.f32 %v2350_v46, %v1299_v55 }
0x1205   : > { %v1301_v58 = vadd.f32 0.27886808, %v1300_v56 }
0x1207   : > { %v1302_v59 = vmul.f32 %v2350_v46, %v1301_v58 }
0x1209   : > { %v1303_v9 = vadd.f32 -0.18628806, %v1302_v59 }
0x120b   : > { %v1304_v62 = vmul.f32 %v2350_v46, %v1303_v9 }
0x120d   : > { %v1305_v1 = vadd.f32 0.09678418, %v1304_v62 }
0x120f   : > { %v1306_v2 = vmul.f32 %v2350_v46, %v1305_v1 }
0x1211   : > { %v1307_v4 = vadd.f32 0.37409195, %v1306_v2 }
0x1213   : > { %v1308_v51 = vmul.f32 %v2350_v46, %v1307_v4 }
0x1215   : > { %v1309_v3 = vadd.f32 1.0000237, %v1308_v51 }
0x1217   : > { %v1310_v7 = vmul.f32 %v2350_v46, %v1309_v3 }
0x1219   : > { %v1311_v8 = vadd.f32 -1.2655122, %v1310_v7 }
0x121b   : > { %v1314_v11 = vadd.f32 %v1313_v10, %v1311_v8 }
0x121d   : > { %v1315_v12 = vmul.f32 1.442695, %v1314_v11 }
0x121f   : > { %2351 = vpow2.f32 %v1315_v12 }
0x1225   : > { %v2352_v61 = vpop.eup %2351 }
0x1226   : > { %v1317_v13 = vmul.f32 %v2352_v61, %v2350_v46  ;;  %v2832_v46 = vld [vmem:[%s2974_s5 + $0x10] sm:$0xff] }
0x1227   : > { %v1434_v22 = vperm.slane %v2832_v46, 0  ;;  %v1436_v52 = vperm.slane %v2832_v46, 1  ;;  %v1439_v56 = vperm.slane %v2832_v46, 7 }
0x1228   : > { %v1319_v14 = vsub.f32 1.0, %v1317_v13  ;;  %v2113_v16 = vadd.f32 -1.0, %v1317_v13 }
0x122a   : > { %v1321_v17 = vsel %vm1318_vm11, %v1319_v14, %v2113_v16 }
0x122b   : > { %v1322_v19 = vadd.f32 1.0, %v1321_v17 }
0x122d   : > { %v1323_v20 = vmul.f32 %v1322_v19, %v1288_v63 }
0x122f   : > { %v1324_v21 = vpack.c.bf16 %v1323_v20, %v1323_v20 }
0x1231   : > { %1382 = vmatmul.bf16.vlgmr.msra.gmra.mxu1 %v1324_v21 }
0x12ae   : > { %v1383_v24 = vpop.f32.mrf.mxu1 }
0x12af   : > { %v1384_v25 = vadd.f32 %v1383_v24, %v1325_v23 }
0x12b1   : > { %v2803_v42 = vadd.f32 %v1384_v25, %v2753_v5  ;;  %v2269_v5 = vld [vmem:[%s2972_s3 + $0x54] sm:$0xf0] }
0x12b2   : > { %v2816_v33 = vor.u32 %v2269_v5, %v2173_v18 }
0x12b3   : > { %v1412_v39 = vsel %vm408_vm1, %v2803_v42, 0.0 }
0x12b4   : > { %1413 = vadd.xlane.f32.xlu0 %v1412_v39  ;;  %1461 = vmatpush.bf16.msra.mxu2 %v2816_v33 }
0x12b6   : > { %v1385_v6 = vpop.f32.mrf.mxu1 }
0x12b8   : > { %1462 = vmatpush.bf16.msra.mxu2 %v2825_v36 }
0x1327   : > { %v1414_v26 = vpop.xlane.xlu0 %1413 }
0x1328   : > { %v1415_v27 = vmul.f32 %v1414_v26, %v2495_v31 }
0x132a   : > { %v1416_v28 = vsub.f32 %v2803_v42, %v1415_v27 }
0x132c   : > { %v1417_v30 = vmul.f32 %v1416_v28, %v1416_v28 }
0x132e   : > { %v1418_v32 = vsel %vm408_vm1, %v1417_v30, 0.0 }
0x132f   : > { %1419 = vadd.xlane.f32.xlu2 %v1418_v32 }
0x13a2   : > { %v1420_v37 = vpop.xlane.xlu2 %1419 }
0x13a3   : > { %v1421_v40 = vmul.f32 %v1420_v37, %v2495_v31 }
0x13a5   : > { %v1422_v41 = vadd.f32 1e-06, %v1421_v40 }
0x13a7   : > { %2353 = vrsqrt.f32 %v1422_v41  ;;  %vm1429_vm13 = vweird.f32 %v1422_v41 }
0x13ad   : > { %v2354_v43 = vpop.eup %2353 }
0x13ae   : > { %v1424_v44 = vmul.f32 %v2354_v43, %v1422_v41  ;;  %vm1430_vm12 = vweird.f32 %v2354_v43 }
0x13af   : > { %vm1431_vm14 = vmor %vm1429_vm13, %vm1430_vm12 }
0x13b0   : > { %v1425_v45 = vmul.f32 %v2354_v43, %v1424_v44 }
0x13b2   : > { %v1426_v29 = vmul.f32 0.5, %v1425_v45 }
0x13b4   : > { %v1427_v47 = vsub.f32 1.5, %v1426_v29 }
0x13b6   : > { %v1428_v48 = vmul.f32 %v2354_v43, %v1427_v47 }
0x13b8   : > { %v1432_v49 = vsel %vm1431_vm14, %v2354_v43, %v1428_v48 }
0x13b9   : > { %v1433_v50 = vmul.f32 %v1432_v49, %v1416_v28 }
0x13bb   : > { %v1435_v53 = vmul.f32 %v1434_v22, %v1433_v50 }
0x13bd   : > { %v1437_v54 = vadd.f32 %v1436_v52, %v1435_v53 }
0x13bf   : > { %v1438_v55 = vpack.c.bf16 %v1437_v54, %v1437_v54 }
0x13c1   : > { %2175 = vmatmul.msk.bf16.vlgmr.msra.gmra.mxu2 %vm408_vm1, %v1438_v55 }
0x1444   : > { %v1464_v57 = vpop.f32.mrf.mxu2 }
0x1445   : > { %v1465_v58 = vadd.f32 %v1464_v57, %v1439_v56 }
0x1447   : > { %v2838_v59 = vpack.c.bf16 %v1465_v58, %v1465_v58 }
0x1449   : > { %1526 = vrot.lane.b32.xlu2 %v2838_v59, %s2386_s17  ;;  %1470 = vrot.lane.b32.xlu1 %v2838_v59, %s2388_s19  ;;  %s2980_s17 = smov 16  }
0x144c   : > { %v1466_v60 = vpop.f32.mrf.mxu2 }
0x1451   : > { %1638 = vrot.lane.b32.xlu2 %v2838_v59, %s2391_s24  ;;  %1503 = vrot.lane.b32.xlu1 %v2838_v59, %s2387_s18 }
0x1459   : > { %1580 = vrot.lane.b32.xlu2 %v2838_v59, %s2392_s25  ;;  %1636 = vrot.lane.b32.xlu1 %v2838_v59, %s2394_s26 }
0x14a3   : > { %v1527_v9 = vpop.permute.xlu2 %1526 }
0x14a4   : > { %v1532_v62 = vsel %vm476_vm7, %v1527_v9, 0 }
0x14a5   : > { %1541 = vmatpush.bf16.xpose.msrb.mxu2 %v1532_v62 }
0x14ab   : > { %v1639_v0 = vpop.permute.xlu2 %1638 }
0x14ac   : > { %v1644_v1 = vsel %vm476_vm7, %v1639_v0, 0 }
0x14ad   : > { %1653 = vmatpush.bf16.xpose.msra.mxu2 %v1644_v1 }
0x14b3   : > { %v1581_v26 = vpop.permute.xlu2 %1580 }
0x14bb   : > { %v1471_v2 = vpop.permute.xlu1 %1470 }
0x14bc   : > { %v1476_v4 = vsel %vm476_vm7, %v1471_v2, 0 }
0x14bd   : > { %1485 = vmatpush.bf16.xpose.msra.mxu3 %v1476_v4 }
0x14c3   : > { %v1504_v51 = vpop.permute.xlu1 %1503 }
0x14c4   : > { %v1509_v3 = vsel %vm513_vm6, %v1504_v51, 0  ;;  %2176 = vmatmul.msk.bf16.vlgmr.msra.gmra.mxu3 %vm476_vm7, %v2838_v59 }
0x14c5   : > { %1518 = vmatpush.bf16.msrb.mxu0 %v1509_v3 }
0x14cb   : > { %v1637_v17 = vpop.permute.xlu1 %1636 }
0x1547   : > { %v1487_v38 = vpop.f32.mrf.mxu3 }
0x1548   : > { %v1488_v7 = vadd.f32 %v1487_v38, %v2552_v15 }
0x154a   : > { %v1491_v8 = vsel %vm476_vm7, %v1488_v7, -inf }
0x154b   : > { %1492 = vmax.xlane.f32.xlu0 %v1491_v8 }
0x154f   : > { %v1489_v10 = vpop.f32.mrf.mxu3 }
0x155f   : > { %1524 = vrot.lane.b32.xlu0 %v2838_v59, %s2390_s23 }
0x15be   : > { %v1493_v11 = vpop.xlane.xlu0 %1492 }
0x15bf   : > { %v1494_v12 = vsub.f32 %v1488_v7, %v1493_v11 }
0x15c1   : > { %v1495_v61 = vmul.f32 1.442695, %v1494_v12 }
0x15c3   : > { %2355 = vpow2.f32 %v1495_v61 }
0x15c9   : > { %v2356_v13 = vpop.eup %2355 }
0x15ca   : > { %v1497_v14 = vsel %vm476_vm7, %v2356_v13, 0.0 }
0x15cb   : > { %1498 = vadd.xlane.f32.xlu0 %v1497_v14 }
0x15d1   : > { %v1525_v16 = vpop.permute.xlu0 %1524 }
0x15d2   : > { %2178 = vmatmul.msk.bf16.vlgmr.msrb.gmra.mxu2 %vm476_vm7, %v1525_v16 }
0x15df   : > { %1582 = vrot.lane.b32.xlu0 %v2838_v59, %s2389_s20 }
0x15e2   : > { %2182 = vmatmul.msk.bf16.vlgmr.msra.gmra.mxu2 %vm476_vm7, %v1637_v17 }
0x163e   : > { %v1499_v63 = vpop.xlane.xlu0 %1498 }
0x163f   : > { %2357 = vrcp.f32 %v1499_v63 }
0x1645   : > { %v2358_v19 = vpop.eup %2357 }
0x1646   : > { %v1501_v20 = vmul.f32 %v2358_v19, %v2356_v13 }
0x1648   : > { %v1502_v21 = vpack.c.bf16 %v1501_v20, %v1501_v20 }
0x164a   : > { %2177 = vmatmul.msk.bf16.vlgmr.msrb.gmra.mxu0 %vm476_vm7, %v1502_v21 }
0x1651   : > { %v1583_v23 = vpop.permute.xlu0 %1582 }
0x1652   : > { %v1588_v24 = vsel %vm476_vm7, %v1583_v23, 0 }
0x1653   : > { %1597 = vmatpush.bf16.xpose.msra.mxu0 %v1588_v24 }
0x1655   : > { %v1543_v25 = vpop.f32.mrf.mxu2 }
0x1656   : > { %v1544_v39 = vadd.f32 %v1543_v25, %v2552_v15 }
0x1658   : > { %v1547_v6 = vsel %vm476_vm7, %v1544_v39, -inf }
0x1659   : > { %1548 = vmax.xlane.f32.xlu1 %v1547_v6  ;;  %v1708_v6 = vperm.slane %v2832_v46, 4 }
0x165a   : > { %2180 = vmatmul.msk.bf16.vlgmr.msra.gmra.mxu0 %vm476_vm7, %v1581_v26 }
0x165d   : > { %v1545_v27 = vpop.f32.mrf.mxu2 }
0x1665   : > { %v1655_v28 = vpop.f32.mrf.mxu2 }
0x1666   : > { %v1656_v30 = vadd.f32 %v1655_v28, %v2552_v15 }
0x1668   : > { %v1659_v32 = vsel %vm476_vm7, %v1656_v30, -inf }
0x1669   : > { %1660 = vmax.xlane.f32.xlu0 %v1659_v32 }
0x166d   : > { %v1657_v18 = vpop.f32.mrf.mxu2 }
0x16c7   : > { %v2874_v5 = vpop.f32.mrf.mxu0 }
0x16cc   : > { %v1549_v34 = vpop.xlane.xlu1 %1548 }
0x16cd   : > { %v1550_v35 = vsub.f32 %v1544_v39, %v1549_v34 }
0x16cf   : > { %v1551_v37 = vmul.f32 1.442695, %v1550_v35  ;;  %v1522_v40 = vpop.f32.mrf.mxu0 }
0x16d0   : > { %v2268_v40 = vld [vmem:[%s2972_s3 + $0x54] sm:$0xf] }
0x16d1   : > { %2359 = vpow2.f32 %v1551_v37 }
0x16d7   : > { %v2360_v41 = vpop.eup %2359  ;;  %v1599_v43 = vpop.f32.mrf.mxu0 }
0x16d8   : > { %v1600_v44 = vadd.f32 %v1599_v43, %v2552_v15  ;;  %v1553_v45 = vsel %vm476_vm7, %v2360_v41, 0.0  ;;  %v2266_v43 = vld [vmem:[%s2972_s3 + $0x44] sm:$0xf] }
0x16d9   : > { %1554 = vadd.xlane.f32.xlu1 %v1553_v45 }
0x16da   : > { %v1603_v29 = vsel %vm476_vm7, %v1600_v44, -inf }
0x16db   : > { %1604 = vmax.xlane.f32.xlu2 %v1603_v29 }
0x16dc   : > { %v1661_v47 = vpop.xlane.xlu0 %1660 }
0x16dd   : > { %v1662_v48 = vsub.f32 %v1656_v30, %v1661_v47 }
0x16df   : > { %v1663_v22 = vmul.f32 1.442695, %v1662_v48  ;;  %v1601_v49 = vpop.f32.mrf.mxu0 }
0x16e1   : > { %2361 = vpow2.f32 %v1663_v22 }
0x16e7   : > { %v2362_v50 = vpop.eup %2361 }
0x16e8   : > { %v1665_v52 = vsel %vm476_vm7, %v2362_v50, 0.0 }
0x16e9   : > { %1666 = vadd.xlane.f32.xlu0 %v1665_v52 }
0x16f3   : > { %1559 = vrot.lane.b32.xlu2 %v2838_v59, %s2395_s27 }
0x16fb   : > { %1711 = vrot.lane.b32.xlu2 %v2816_v33, %s2399_s7 }
0x16fd   : > { %1671 = vrot.lane.b32.xlu0 %v2838_v59, %s2397_s29  ;;  %s247_s29 = scalar_lea.vmem %s2975_s6, %s2982_s22 }
0x174c   : > { %v1555_v15 = vpop.xlane.xlu1 %1554 }
0x174d   : > { %2363 = vrcp.f32 %v1555_v15 }
0x174e   : > { %v1605_v53 = vpop.xlane.xlu2 %1604 }
0x174f   : > { %v1606_v54 = vsub.f32 %v1600_v44, %v1605_v53  ;;  %v2185_v44 = vld [vmem:[%s2972_s3 + $0x48] sm:$0xf0] }
0x1750   : > { %v2188_v45 = vor.u32 %v2266_v43, %v2185_v44 }
0x1751   : > { %v1607_v55 = vmul.f32 1.442695, %v1606_v54  ;;  %v1754_v54 = vperm.slane %v2832_v46, 2 }
0x1753   : > { %v2364_v56 = vpop.eup %2363  ;;  %2365 = vpow2.f32 %v1607_v55 }
0x1754   : > { %v1557_v57 = vmul.f32 %v2364_v56, %v2360_v41 }
0x1756   : > { %v1560_v58 = vpop.permute.xlu2 %1559  ;;  %v1558_v62 = vpack.c.bf16 %v1557_v57, %v1557_v57  ;;  %v1756_v57 = vperm.slane %v2832_v46, 3 }
0x1757   : > { %v1565_v60 = vsel %vm513_vm6, %v1560_v58, 0 }
0x1758   : > { %1574 = vmatpush.bf16.msrb.mxu3 %v1565_v60 }
0x1759   : > { %v2366_v9 = vpop.eup %2365 }
0x175a   : > { %v1609_v0 = vsel %vm476_vm7, %v2366_v9, 0.0 }
0x175b   : > { %1610 = vadd.xlane.f32.xlu1 %v1609_v0  ;;  %2179 = vmatmul.msk.bf16.vlgmr.msrb.gmra.mxu3 %vm476_vm7, %v1558_v62 }
0x175c   : > { %v1667_v33 = vpop.xlane.xlu0 %1666 }
0x175d   : > { %2367 = vrcp.f32 %v1667_v33 }
0x1763   : > { %v2368_v1 = vpop.eup %2367 }
0x1764   : > { %v1669_v2 = vmul.f32 %v2368_v1, %v2362_v50 }
0x1766   : > { %v1670_v3 = vpack.c.bf16 %v1669_v2, %v1669_v2 }
0x176f   : > { %v1672_v4 = vpop.permute.xlu0 %1671 }
0x1770   : > { %v1677_v51 = vsel %vm513_vm6, %v1672_v4, 0 }
0x1771   : > { %1686 = vmatpush.bf16.msra.mxu3 %v1677_v51 }
0x1774   : > { %1615 = vrot.lane.b32.xlu1 %v2838_v59, %s2396_s28  ;;  %2183 = vmatmul.msk.bf16.vlgmr.msra.gmra.mxu3 %vm476_vm7, %v1670_v3  ;;  %v2277_v3 = vld [vmem:[%s2973_s4 + $0xb8] sm:$0xff] }
0x1775   : > { %1870 = vmatpush.bf16.msrb.mxu2 %v2277_v3 }
0x177c   : > { %1709 = vrot.lane.b32.xlu1 %v2825_v36, %s2399_s7  ;;  %v1712_v36 = vpop.permute.xlu2 %1711 }
0x177d   : > { %1724 = vmatpush.bf16.msrb.mxu0 %v1712_v36 }
0x17ce   : > { %v1611_v38 = vpop.xlane.xlu1 %1610 }
0x17cf   : > { %2369 = vrcp.f32 %v1611_v38  ;;  %v2276_v38 = vld [vmem:[%s2973_s4 + $0xb0] sm:$0xff] }
0x17d0   : > { %1871 = vmatpush.bf16.msrb.mxu2 %v2276_v38 }
0x17d5   : > { %v2370_v8 = vpop.eup %2369 }
0x17d6   : > { %v1613_v10 = vmul.f32 %v2370_v8, %v2366_v9  ;;  %v1759_v9 = vperm.slane %v2832_v46, 6 }
0x17d8   : > { %v1614_v13 = vpack.c.bf16 %v1613_v10, %v1613_v10  ;;  %v2275_v10 = vld [vmem:[%s2973_s4 + $0xa8] sm:$0xff] }
0x17d9   : > { %1872 = vmatpush.bf16.msrb.mxu2 %v2275_v10 }
0x17de   : > { %v1576_v7 = vpop.f32.mrf.mxu3 }
0x17df   : > { %1693 = vrot.lane.b32.xlu0 %v1576_v7, %s2398_s30 }
0x17e6   : > { %v1578_v11 = vpop.f32.mrf.mxu3  ;;  %v1616_v12 = vpop.permute.xlu1 %1615 }
0x17e7   : > { %v1621_v61 = vsel %vm513_vm6, %v1616_v12, 0 }
0x17e8   : > { %1630 = vmatpush.bf16.msrb.mxu1 %v1621_v61  ;;  %v2274_v61 = vld [vmem:[%s2973_s4 + $0xa0] sm:$0xff] }
0x17e9   : > { %1873 = vmatpush.bf16.msrb.mxu2 %v2274_v61 }
0x17eb   : > { %2181 = vmatmul.msk.bf16.vlgmr.msrb.gmra.mxu1 %vm476_vm7, %v1614_v13 }
0x17ee   : > { %v1710_v63 = vpop.permute.xlu1 %1709 }
0x17ef   : > { %1725 = vmatpush.bf16.msrb.mxu0 %v1710_v63 }
0x17f7   : > { %v1688_v59 = vpop.f32.mrf.mxu3 }
0x17f8   : > { %1701 = vrot.lane.b32.xlu0 %v1688_v59, %s2979_s11 }
0x17ff   : > { %v1690_v14 = vpop.f32.mrf.mxu3 }
0x1800   : > { %v2273_v14 = vld [vmem:[%s2973_s4 + $0x98] sm:$0xff] }
0x1801   : > { %1874 = vmatpush.bf16.msrb.mxu2 %v2273_v14 }
0x1851   : > { %v1694_v19 = vpop.permute.xlu0 %1693 }
0x1852   : > { %v1704_v20 = vsel %vm476_vm7, %v2874_v5, %v1694_v19 }
0x1868   : > { %v1632_v16 = vpop.f32.mrf.mxu1 }
0x1869   : > { %1697 = vrot.lane.b32.xlu2 %v1632_v16, %s2980_s17 }
0x186a   : > { %v1702_v23 = vpop.permute.xlu0 %1701 }
0x1870   : > { %v1634_v17 = vpop.f32.mrf.mxu1 }
0x1871   : > { %v2272_v17 = vld [vmem:[%s2973_s4 + $0x90] sm:$0xff] }
0x1872   : > { %1875 = vmatpush.bf16.msrb.mxu2 %v2272_v17 }
0x18c3   : > { %v1698_v21 = vpop.permute.xlu2 %1697 }
0x18c4   : > { %v1705_v24 = vsel %vm711_vm9, %v1704_v20, %v1698_v21  ;;  %v2271_v20 = vld [vmem:[%s2973_s4 + $0x88] sm:$0xff] }
0x18c5   : > { %v1706_v25 = vsel %vm713_vm10, %v1705_v24, %v1702_v23  ;;  %1876 = vmatpush.bf16.msrb.mxu2 %v2271_v20  ;;  %v2270_v24 = vld [vmem:[%s2973_s4 + $0x80] sm:$0xff] }
0x18c6   : > { %v1707_v39 = vpack.c.bf16 %v1706_v25, %v1706_v25 }
0x18c8   : > { %2184 = vmatmul.msk.bf16.vlgmr.msrb.gmra.mxu0 %vm408_vm1, %v1707_v39 }
0x18c9   : > { %1877 = vmatpush.bf16.msrb.mxu2 %v2270_v24 }
0x1945   : > { %v1727_v26 = vpop.f32.mrf.mxu0 }
0x1946   : > { %v1728_v27 = vadd.f32 %v1727_v26, %v1708_v6 }
0x1948   : > { %v2907_v28 = vadd.f32 %v1728_v27, %v2803_v42  ;;  %v2189_v42 = vld [vmem:[%s2972_s3 + $0x58] sm:$0xf0] }
0x1949   : > { %v2192_v41 = vor.u32 %v2268_v40, %v2189_v42 }
0x194a   : > { %v1732_v30 = vsel %vm408_vm1, %v2907_v28, 0.0 }
0x194b   : > { %1733 = vadd.xlane.f32.xlu2 %v1732_v30  ;;  %1777 = vmatpush.bf16.msra.mxu1 %v2192_v41 }
0x194d   : > { %v1729_v32 = vpop.f32.mrf.mxu0 }
0x194f   : > { %1778 = vmatpush.bf16.msra.mxu1 %v2188_v45 }
0x19be   : > { %v1734_v18 = vpop.xlane.xlu2 %1733 }
0x19bf   : > { %v1735_v5 = vmul.f32 %v1734_v18, %v2495_v31 }
0x19c1   : > { %v1736_v34 = vsub.f32 %v2907_v28, %v1735_v5 }
0x19c3   : > { %v1737_v35 = vmul.f32 %v1736_v34, %v1736_v34 }
0x19c5   : > { %v1738_v37 = vsel %vm408_vm1, %v1737_v35, 0.0 }
0x19c6   : > { %1739 = vadd.xlane.f32.xlu0 %v1738_v37 }
0x1a39   : > { %v1740_v29 = vpop.xlane.xlu0 %1739 }
0x1a3a   : > { %v1741_v47 = vmul.f32 %v1740_v29, %v2495_v31 }
0x1a3c   : > { %v1742_v48 = vadd.f32 1e-06, %v1741_v47 }
0x1a3e   : > { %2371 = vrsqrt.f32 %v1742_v48  ;;  %vm1749_vm7 = vweird.f32 %v1742_v48 }
0x1a44   : > { %v2372_v22 = vpop.eup %2371 }
0x1a45   : > { %v1744_v49 = vmul.f32 %v2372_v22, %v1742_v48  ;;  %vm1750_vm6 = vweird.f32 %v2372_v22  ;;  %v1821_v48 = vperm.slane %v2832_v46, 5 }
0x1a46   : > { %vm1751_vm9 = vmor %vm1749_vm7, %vm1750_vm6 }
0x1a47   : > { %v1745_v50 = vmul.f32 %v2372_v22, %v1744_v49 }
0x1a49   : > { %v1746_v52 = vmul.f32 0.5, %v1745_v50 }
0x1a4b   : > { %v1747_v15 = vsub.f32 1.5, %v1746_v52 }
0x1a4d   : > { %v1748_v53 = vmul.f32 %v2372_v22, %v1747_v15 }
0x1a4f   : > { %v1752_v55 = vsel %vm1751_vm9, %v2372_v22, %v1748_v53 }
0x1a50   : > { %v1753_v56 = vmul.f32 %v1752_v55, %v1736_v34 }
0x1a52   : > { %v1755_v58 = vmul.f32 %v1754_v54, %v1753_v56 }
0x1a54   : > { %v1757_v60 = vadd.f32 %v1756_v57, %v1755_v58 }
0x1a56   : > { %v1758_v31 = vpack.c.bf16 %v1757_v60, %v1757_v60 }
0x1a58   : > { %2193 = vmatmul.msk.bf16.vlgmr.msra.gmra.mxu1 %vm408_vm1, %v1758_v31 }
0x1ad5   : > { %v1780_v62 = vpop.f32.mrf.mxu1 }
0x1ad6   : > { %v1781_v0 = vadd.f32 %v1780_v62, %v1759_v9 }
0x1ad8   : > { %v1785_v33 = vmul.f32 0.70710677, %v1781_v0  ;;  %v1784_v44 = vmul.f32 0.5, %v1781_v0 }
0x1ada   : > { %v1786_v1 = vand.u32 2147483647, %v1785_v33  ;;  %vm1814_vm10 = vcmp.ge.f32.partialorder %v1785_v33, 0.0 }
0x1adc   : > { %v1787_v2 = vmul.f32 0.5, %v1786_v1  ;;  %v1808_v30 = vsub.f32 0.0, %v1786_v1 }
0x1add   : > { %v1782_v4 = vpop.f32.mrf.mxu1 }
0x1ade   : > { %v1788_v51 = vadd.f32 1.0, %v1787_v2  ;;  %v1809_v5 = vmul.f32 %v1808_v30, %v1786_v1 }
0x1ae0   : > { %2373 = vrcp.f32 %v1788_v51 }
0x1ae6   : > { %v2374_v7 = vpop.eup %2373 }
0x1ae7   : > { %v1790_v8 = vmul.f32 0.17087276, %v2374_v7 }
0x1ae9   : > { %v1791_v11 = vadd.f32 -0.82215226, %v1790_v8 }
0x1aeb   : > { %v1792_v12 = vmul.f32 %v2374_v7, %v1791_v11 }
0x1aed   : > { %v1793_v13 = vadd.f32 1.4885159, %v1792_v12 }
0x1aef   : > { %v1794_v59 = vmul.f32 %v2374_v7, %v1793_v13 }
0x1af1   : > { %v1795_v36 = vadd.f32 -1.135204, %v1794_v59 }
0x1af3   : > { %v1796_v16 = vmul.f32 %v2374_v7, %v1795_v36 }
0x1af5   : > { %v1797_v63 = vadd.f32 0.27886808, %v1796_v16 }
0x1af7   : > { %v1798_v19 = vmul.f32 %v2374_v7, %v1797_v63 }
0x1af9   : > { %v1799_v21 = vadd.f32 -0.18628806, %v1798_v19 }
0x1afb   : > { %v1800_v23 = vmul.f32 %v2374_v7, %v1799_v21 }
0x1afd   : > { %v1801_v25 = vadd.f32 0.09678418, %v1800_v23 }
0x1aff   : > { %v1802_v39 = vmul.f32 %v2374_v7, %v1801_v25 }
0x1b01   : > { %v1803_v6 = vadd.f32 0.37409195, %v1802_v39 }
0x1b03   : > { %v1804_v26 = vmul.f32 %v2374_v7, %v1803_v6 }
0x1b05   : > { %v1805_v27 = vadd.f32 1.0000237, %v1804_v26 }
0x1b07   : > { %v1806_v32 = vmul.f32 %v2374_v7, %v1805_v27 }
0x1b09   : > { %v1807_v18 = vadd.f32 -1.2655122, %v1806_v32 }
0x1b0b   : > { %v1810_v34 = vadd.f32 %v1809_v5, %v1807_v18 }
0x1b0d   : > { %v1811_v35 = vmul.f32 1.442695, %v1810_v34 }
0x1b0f   : > { %2375 = vpow2.f32 %v1811_v35 }
0x1b15   : > { %v2376_v37 = vpop.eup %2375 }
0x1b16   : > { %v1813_v40 = vmul.f32 %v2376_v37, %v2374_v7 }
0x1b18   : > { %v1815_v42 = vsub.f32 1.0, %v1813_v40  ;;  %v2194_v41 = vadd.f32 -1.0, %v1813_v40 }
0x1b1a   : > { %v1817_v43 = vsel %vm1814_vm10, %v1815_v42, %v2194_v41 }
0x1b1b   : > { %v1818_v45 = vadd.f32 1.0, %v1817_v43 }
0x1b1d   : > { %v1819_v29 = vmul.f32 %v1818_v45, %v1784_v44 }
0x1b1f   : > { %v1820_v47 = vpack.c.bf16 %v1819_v29, %v1819_v29 }
0x1b21   : > { %1878 = vmatmul.bf16.vlgmr.msrb.gmra.mxu2 %v1820_v47 }
0x1ba4   : > { %v1879_v22 = vpop.f32.mrf.mxu2 }
0x1ba5   : > { %v1880_v49 = vadd.f32 %v1879_v22, %v1821_v48 }
0x1ba7   : > { %v1883_v50 = vadd.f32 %v1880_v49, %v2907_v28 }
0x1ba9   : > { %v1885_v52 = vrot.slane %v1883_v50, 1  ;;  %v1889_v53 = vrot.slane %v1883_v50, 2  ;;  %v1893_v54 = vrot.slane %v1883_v50, 3 }
0x1bab   : > { %1886 = vrot.lane.b32.xlu1 %v1885_v52, %s2399_s7 }
0x1bac   : > { %v1881_v15 = vpop.f32.mrf.mxu2 }
0x1bb3   : > { %1890 = vrot.lane.b32.xlu1 %v1889_v53, %s2387_s18 }
0x1bbb   : > { %1894 = vrot.lane.b32.xlu1 %v1893_v54, %s2388_s19 }
0x1c1d   : > { %v1887_v55 = vpop.permute.xlu1 %1886 }
0x1c1e   : > { %v1897_v57 = vsel %vm408_vm1, %v1883_v50, %v1887_v55 }
0x1c25   : > { %v1891_v56 = vpop.permute.xlu1 %1890 }
0x1c26   : > { %v1898_v46 = vsel %vm353_vm0, %v1897_v57, %v1891_v56 }
0x1c2d   : > { %v1895_v28 = vpop.permute.xlu1 %1894 }
0x1c2e   : > { %v1900_v58 = vsel %vm1899_vm15, %v1898_v46, %v1895_v28 }
0x1c2f   : > { %1901 = vst [vmem:[%s247_s29 - $0x1] sm:$0x2] %v1900_v58 }
0x1c30 PF: > { %s16_s21 = sadd.s32 1, %s2383_s21  }
0x1c31   : > { %p13_p4 = scmp.ge.s32.totalorder %s16_s21, 4  }
0x1c33   :  { %15 = sbr.rel (!%p13_p4) target bundleno = 1 (0x1), region = 80 }

</bundles_post_ra>
